<compile_context>
chip_gen: v7x
topology: tpu7x:2x2x1
jax: 0.10.0
libtpu: 0.0.40
codegen_flags: <defaults>
</compile_context>

<pallas_src>
import functools
import math

import jax
import jax.numpy as jnp
from jax.experimental import pallas as pl
from jax.experimental.pallas import tpu as pltpu


# ----------------------------- helpers -----------------------------

def _gelu_tanh(x):
    # TODO(synk): HF DistilBERT uses exact erf-GELU; tanh approximation kept because
    # erf lowering availability varies across Mosaic versions.
    c = math.sqrt(2.0 / math.pi)
    return 0.5 * x * (1.0 + jnp.tanh(c * (x + 0.044715 * x * x * x)))


def _layernorm(x, g, b, eps):
    # f32 elementwise math (v5e-safe); x:[M,H], g/b:[1,H]
    mu = jnp.mean(x, axis=-1, keepdims=True)
    var = jnp.mean(jnp.square(x - mu), axis=-1, keepdims=True)
    return (x - mu) * jax.lax.rsqrt(var + eps) * g + b


def _w_slab_rows(hidden, ffn, n_layers):
    per_layer = 3 * hidden + ffn          # wqkv(H rows) + wo(H) + w1(H) + w2(FFN)
    return n_layers * per_layer + hidden, per_layer


def _p_slab_rows(n_layers):
    # rows: emb_ln_g, emb_ln_b, classifier bias, then 8 rows per layer:
    #   bqkv, bo, ln1_g, ln1_b, b1, b2, ln2_g, ln2_b
    return 3 + 8 * n_layers


# ----------------------------- fused Pallas kernel -----------------------------

def _bert_kernel(x_ref, mask_ref, wslab_ref, pslab_ref, out_ref, *,
                 n_layers, n_heads, hidden, ffn, eps):
    S = x_ref.shape[0]
    H = hidden
    Dh = H // n_heads
    per_layer_w = 3 * H + ffn

    def prow(row, width):
        # static row / leading-lane slice of the packed f32 bias/LN slab -> [1, width]
        return pslab_ref[row:row + 1, 0:width]

    # ---- embedding LayerNorm on the [S, H] token slab of this batch element ----
    x = x_ref[...].astype(jnp.float32)                          # [S, H] f32
    x = _layernorm(x, prow(0, H), prow(1, H), eps)

    # additive key-mask bias: 0 where keep, -1e9 where masked    [1, S]
    bias = (mask_ref[...] - 1.0) * 1e9

    for l in range(n_layers):                                   # static unrolled layer loop
        wb = l * per_layer_w
        pb = 3 + 8 * l

        # ---- fused QKV projection (softmax scale already folded into Q weights) ----
        qkv = jnp.dot(x.astype(jnp.bfloat16), wslab_ref[wb:wb + H, 0:3 * H],
                      preferred_element_type=jnp.float32) + prow(pb + 0, 3 * H)   # [S, 3H]
        qkv = qkv.astype(jnp.bfloat16)

        # ---- multi-head self-attention, all heads batched in one einsum ----
        q = qkv[:, 0:H].reshape(S, n_heads, Dh)                 # [S, nh, Dh]
        k = qkv[:, H:2 * H].reshape(S, n_heads, Dh)
        v = qkv[:, 2 * H:3 * H].reshape(S, n_heads, Dh)

        s = jnp.einsum("qhd,khd->hqk", q, k,
                       preferred_element_type=jnp.float32)      # [nh, S, S] f32
        s = s + bias                                            # broadcast over heads/queries
        mx = jnp.max(s, axis=-1, keepdims=True)
        p = jnp.exp(s - mx)
        p = p * pl.reciprocal(jnp.sum(p, axis=-1, keepdims=True), approx=True)  # EUP slot
        ctx = jnp.einsum("hqk,khd->qhd", p.astype(jnp.bfloat16), v,
                         preferred_element_type=jnp.float32)    # [S, nh, Dh] f32
        ctx = ctx.reshape(S, H)

        # ---- output projection + residual + LN1 ----
        attn = jnp.dot(ctx.astype(jnp.bfloat16), wslab_ref[wb + H:wb + 2 * H, 0:H],
                       preferred_element_type=jnp.float32) + prow(pb + 1, H)
        x = _layernorm(attn + x, prow(pb + 2, H), prow(pb + 3, H), eps)

        # ---- FFN + residual + LN2 ----
        ff = jnp.dot(x.astype(jnp.bfloat16), wslab_ref[wb + 2 * H:wb + 3 * H, 0:ffn],
                     preferred_element_type=jnp.float32) + prow(pb + 4, ffn)
        ff = _gelu_tanh(ff)
        ff = jnp.dot(ff.astype(jnp.bfloat16), wslab_ref[wb + 3 * H:wb + 3 * H + ffn, 0:H],
                     preferred_element_type=jnp.float32) + prow(pb + 5, H)
        x = _layernorm(ff + x, prow(pb + 6, H), prow(pb + 7, H), eps)

    # ---- classifier over all S tokens: lane-dense [S, 128] store (CLS row picked outside) ----
    wc0 = n_layers * per_layer_w
    logits = jnp.dot(x.astype(jnp.bfloat16), wslab_ref[wc0:wc0 + H, 0:128],
                     preferred_element_type=jnp.float32) + prow(2, 128)
    out_ref[...] = logits


# ----------------------------- parameters (packed slabs) -----------------------------

def init_params(key, *, vocab=100, max_pos=16, hidden=64, n_layers=2,
                n_heads=4, ffn=128, num_classes=5):
    H = hidden
    Dh = H // n_heads
    W = 3 * H                                       # lane width of both slabs

    def nrm(k, shape, scale=0.02):
        return (scale * jax.random.normal(k, shape)).astype(jnp.float32)

    keys = jax.random.split(key, 7)
    word_emb = nrm(keys[0], (vocab, H))
    pos_emb = nrm(keys[1], (max_pos, H))

    wqkv = nrm(keys[2], (n_layers, H, 3 * H))
    wqkv = wqkv.at[:, :, :H].multiply(1.0 / math.sqrt(Dh))   # fold softmax scale into Q
    wo = nrm(keys[3], (n_layers, H, H))
    w1 = nrm(keys[4], (n_layers, H, ffn))
    w2 = nrm(keys[5], (n_layers, ffn, H))
    wc = nrm(keys[6], (H, num_classes))

    # ---- bf16 weight slab ----
    wrows, per_layer = _w_slab_rows(H, ffn, n_layers)
    wslab = jnp.zeros((wrows, W), jnp.float32)
    for l in range(n_layers):
        b = l * per_layer
        wslab = wslab.at[b:b + H, 0:3 * H].set(wqkv[l])
        wslab = wslab.at[b + H:b + 2 * H, 0:H].set(wo[l])
        wslab = wslab.at[b + 2 * H:b + 3 * H, 0:ffn].set(w1[l])
        wslab = wslab.at[b + 3 * H:b + 3 * H + ffn, 0:H].set(w2[l])
    wslab = wslab.at[n_layers * per_layer:n_layers * per_layer + H, 0:num_classes].set(wc)
    wslab = wslab.astype(jnp.bfloat16)

    # ---- f32 bias/LayerNorm slab (biases zero, LN gammas one — synthetic init) ----
    prows = _p_slab_rows(n_layers)
    pslab = jnp.zeros((prows, W), jnp.float32)
    pslab = pslab.at[0, 0:H].set(1.0)               # embedding LN gamma
    for l in range(n_layers):
        b = 3 + 8 * l
        pslab = pslab.at[b + 2, 0:H].set(1.0)       # ln1 gamma
        pslab = pslab.at[b + 6, 0:H].set(1.0)       # ln2 gamma

    return {"word_emb": word_emb, "pos_emb": pos_emb, "wslab": wslab, "pslab": pslab}


# ----------------------------- forward (glue + one pallas_call) -----------------------------

def bert_classifier_forward(params, input_ids, attention_mask, *,
                            n_layers, n_heads, ffn, num_classes):
    B, S = input_ids.shape
    H = params["word_emb"].shape[1]

    # TODO(synk): embedding gather could be fused in-kernel (scalar-prefetched input_ids +
    # HBM DMA gather of embedding rows); kept as a tiny XLA gather for lowering robustness.
    h0 = params["word_emb"][input_ids] + params["pos_emb"][jnp.arange(S)][None, :, :]  # [B,S,H]
    mask = attention_mask.astype(jnp.float32).reshape(B, 1, S)

    Rw, Ww = params["wslab"].shape
    Rp, Wp = params["pslab"].shape

    kernel = functools.partial(_bert_kernel, n_layers=n_layers, n_heads=n_heads,
                               hidden=H, ffn=ffn, eps=1e-12)
    logits_padded = pl.pallas_call(
        kernel,
        grid=(B,),
        in_specs=[
            pl.BlockSpec((None, S, H), lambda b: (b, 0, 0)),   # per-batch token slab
            pl.BlockSpec((None, 1, S), lambda b: (b, 0, 0)),   # per-batch mask
            pl.BlockSpec((Rw, Ww), lambda b: (0, 0)),          # bf16 weight slab (resident)
            pl.BlockSpec((Rp, Wp), lambda b: (0, 0)),          # f32 bias/LN slab (resident)
        ],
        out_specs=pl.BlockSpec((None, S, 128), lambda b: (b, 0, 0)),
        out_shape=jax.ShapeDtypeStruct((B, S, 128), jnp.float32),
        compiler_params=pltpu.CompilerParams(dimension_semantics=("parallel",)),
    )(h0, mask, params["wslab"], params["pslab"])

    # CLS token (row 0) logits, trimmed from the 128-lane padded store.
    return logits_padded[:, 0, :num_classes]


# ----------------------------- main -----------------------------

if __name__ == "__main__":
    key = jax.random.PRNGKey(0)
    k_param, k_ids = jax.random.split(key)

    B, S, NUM_CLASSES = 2, 8, 5
    N_LAYERS, N_HEADS, HIDDEN, FFN = 2, 4, 64, 128

    params = init_params(k_param, vocab=100, max_pos=16, hidden=HIDDEN,
                         n_layers=N_LAYERS, n_heads=N_HEADS, ffn=FFN,
                         num_classes=NUM_CLASSES)

    input_ids = jax.random.randint(k_ids, (B, S), 0, 100, dtype=jnp.int32)
    attention_mask = jnp.array([[1, 1, 1, 1, 1, 1, 1, 1],
                                [1, 1, 1, 1, 1, 0, 0, 0]], dtype=jnp.int32)

    forward = jax.jit(functools.partial(bert_classifier_forward,
                                        n_layers=N_LAYERS, n_heads=N_HEADS,
                                        ffn=FFN, num_classes=NUM_CLASSES))
    logits = forward(params, input_ids, attention_mask)
    logits = jax.block_until_ready(logits)
    assert logits.shape == (B, NUM_CLASSES) and logits.dtype == jnp.float32
    print("KERNEL_OK")
</pallas_src>

<mosaic_0001>
module attributes {stable_mosaic.version = 11 : i64} {
  func.func @_bert_kernel(%arg0: i32, %arg1: memref<1x8x64xf32, #tpu.memory_space<vmem>>, %arg2: memref<1x1x8xf32, #tpu.memory_space<vmem>>, %arg3: memref<704x192xbf16, #tpu.memory_space<vmem>>, %arg4: memref<19x192xf32, #tpu.memory_space<vmem>>, %arg5: memref<1x8x128xf32, #tpu.memory_space<vmem>>) attributes {dimension_semantics = [#tpu.dimension_semantics<parallel>], iteration_bounds = array<i64: 2>, scalar_prefetch = 0 : i64, scratch_operands = 0 : i64, tpu.core_type = #tpu.core_type<tc>, window_params = [{transform_indices = @transform_0, window_bounds = array<i64: 1, 8, 64>}, {transform_indices = @transform_1, window_bounds = array<i64: 1, 1, 8>}, {pipeline_mode = #tpu.pipeline_mode<synchronous>, transform_indices = @transform_2, window_bounds = array<i64: 704, 192>}, {pipeline_mode = #tpu.pipeline_mode<synchronous>, transform_indices = @transform_3, window_bounds = array<i64: 19, 192>}, {transform_indices = @transform_4, window_bounds = array<i64: 1, 8, 128>}]} {
    %c0 = arith.constant 0 : index
    %c0_0 = arith.constant 0 : index
    %c0_1 = arith.constant 0 : index
    %0 = vector.load %arg1[%c0, %c0_0, %c0_1] : memref<1x8x64xf32, #tpu.memory_space<vmem>>, vector<1x8x64xf32>
    %1 = vector.shape_cast %0 : vector<1x8x64xf32> to vector<8x64xf32>
    %c0_2 = arith.constant 0 : index
    %c0_3 = arith.constant 0 : index
    %2 = vector.load %arg4[%c0_2, %c0_3] : memref<19x192xf32, #tpu.memory_space<vmem>>, vector<1x64xf32>
    %c1 = arith.constant 1 : index
    %c0_4 = arith.constant 0 : index
    %3 = vector.load %arg4[%c1, %c0_4] : memref<19x192xf32, #tpu.memory_space<vmem>>, vector<1x64xf32>
    %cst = arith.constant dense<0.000000e+00> : vector<8xf32>
    %4 = vector.multi_reduction <add>, %1, %cst [1] : vector<8x64xf32> to vector<8xf32>
    %5 = vector.shape_cast %4 : vector<8xf32> to vector<8x1xf32>
    %cst_5 = arith.constant 6.400000e+01 : f32
    %6 = vector.broadcast %cst_5 : f32 to vector<8x1xf32>
    %7 = arith.divf %5, %6 : vector<8x1xf32>
    %8 = vector.broadcast %7 : vector<8x1xf32> to vector<8x64xf32>
    %9 = arith.subf %1, %8 : vector<8x64xf32>
    %10 = arith.mulf %9, %9 : vector<8x64xf32>
    %cst_6 = arith.constant dense<0.000000e+00> : vector<8xf32>
    %11 = vector.multi_reduction <add>, %10, %cst_6 [1] : vector<8x64xf32> to vector<8xf32>
    %12 = vector.shape_cast %11 : vector<8xf32> to vector<8x1xf32>
    %cst_7 = arith.constant 6.400000e+01 : f32
    %13 = vector.broadcast %cst_7 : f32 to vector<8x1xf32>
    %14 = arith.divf %12, %13 : vector<8x1xf32>
    %15 = vector.broadcast %7 : vector<8x1xf32> to vector<8x64xf32>
    %16 = arith.subf %1, %15 : vector<8x64xf32>
    %cst_8 = arith.constant 9.99999996E-13 : f32
    %17 = vector.broadcast %cst_8 : f32 to vector<8x1xf32>
    %18 = arith.addf %14, %17 : vector<8x1xf32>
    %19 = math.rsqrt %18 : vector<8x1xf32>
    %20 = vector.broadcast %19 : vector<8x1xf32> to vector<8x64xf32>
    %21 = arith.mulf %16, %20 : vector<8x64xf32>
    %22 = vector.broadcast %2 : vector<1x64xf32> to vector<8x64xf32>
    %23 = arith.mulf %21, %22 : vector<8x64xf32>
    %24 = vector.broadcast %3 : vector<1x64xf32> to vector<8x64xf32>
    %25 = arith.addf %23, %24 : vector<8x64xf32>
    %c0_9 = arith.constant 0 : index
    %c0_10 = arith.constant 0 : index
    %c0_11 = arith.constant 0 : index
    %26 = vector.load %arg2[%c0_9, %c0_10, %c0_11] : memref<1x1x8xf32, #tpu.memory_space<vmem>>, vector<1x1x8xf32>
    %27 = vector.shape_cast %26 : vector<1x1x8xf32> to vector<1x8xf32>
    %cst_12 = arith.constant 1.000000e+00 : f32
    %28 = vector.broadcast %cst_12 : f32 to vector<1x8xf32>
    %29 = arith.subf %27, %28 : vector<1x8xf32>
    %cst_13 = arith.constant 1.000000e+09 : f32
    %30 = vector.broadcast %cst_13 : f32 to vector<1x8xf32>
    %31 = arith.mulf %29, %30 : vector<1x8xf32>
    %32 = arith.truncf %25 : vector<8x64xf32> to vector<8x64xbf16>
    %c0_14 = arith.constant 0 : index
    %c0_15 = arith.constant 0 : index
    %33 = vector.load %arg3[%c0_14, %c0_15] : memref<704x192xbf16, #tpu.memory_space<vmem>>, vector<64x192xbf16>
    %cst_16 = arith.constant dense<0.000000e+00> : vector<8x192xf32>
    %34 = tpu.matmul %32, %33, %cst_16 {dimension_numbers = #tpu.dot_dimension_numbers<[1], [0], [0], [1], [0, 0, 1, 1], [], []>} : vector<8x64xbf16>, vector<64x192xbf16>, vector<8x192xf32> -> vector<8x192xf32>
    %c3 = arith.constant 3 : index
    %c0_17 = arith.constant 0 : index
    %35 = vector.load %arg4[%c3, %c0_17] : memref<19x192xf32, #tpu.memory_space<vmem>>, vector<1x192xf32>
    %36 = vector.broadcast %35 : vector<1x192xf32> to vector<8x192xf32>
    %37 = arith.addf %34, %36 : vector<8x192xf32>
    %38 = arith.truncf %37 : vector<8x192xf32> to vector<8x192xbf16>
    %39 = vector.extract_strided_slice %38 {offsets = [0, 0], sizes = [8, 64], strides = [1, 1]} : vector<8x192xbf16> to vector<8x64xbf16>
    %40 = vector.shape_cast %39 : vector<8x64xbf16> to vector<8x4x16xbf16>
    %41 = vector.extract_strided_slice %38 {offsets = [0, 64], sizes = [8, 64], strides = [1, 1]} : vector<8x192xbf16> to vector<8x64xbf16>
    %42 = vector.shape_cast %41 : vector<8x64xbf16> to vector<8x4x16xbf16>
    %43 = vector.extract_strided_slice %38 {offsets = [0, 128], sizes = [8, 64], strides = [1, 1]} : vector<8x192xbf16> to vector<8x64xbf16>
    %44 = vector.shape_cast %43 : vector<8x64xbf16> to vector<8x4x16xbf16>
    "tpu.trace_start"() <{level = 10 : i32, message = "qhd,khd->hqk"}> : () -> ()
    %cst_18 = arith.constant dense<0.000000e+00> : vector<4x8x8xf32>
    %45 = tpu.matmul %40, %42, %cst_18 {dimension_numbers = #tpu.dot_dimension_numbers<[2], [2], [0], [0], [0, 1, 0, 0, 1, 0], [1], [1]>} : vector<8x4x16xbf16>, vector<8x4x16xbf16>, vector<4x8x8xf32> -> vector<4x8x8xf32>
    "tpu.trace_stop"() : () -> ()
    %46 = vector.shape_cast %31 : vector<1x8xf32> to vector<1x1x8xf32>
    %47 = vector.broadcast %46 : vector<1x1x8xf32> to vector<4x8x8xf32>
    %48 = arith.addf %45, %47 : vector<4x8x8xf32>
    %cst_19 = arith.constant dense<0xFF800000> : vector<4x8xf32>
    %49 = vector.multi_reduction <maximumf>, %48, %cst_19 [2] : vector<4x8x8xf32> to vector<4x8xf32>
    %50 = vector.shape_cast %49 : vector<4x8xf32> to vector<4x8x1xf32>
    %51 = vector.broadcast %50 : vector<4x8x1xf32> to vector<4x8x8xf32>
    %52 = arith.subf %48, %51 : vector<4x8x8xf32>
    %53 = math.exp %52 : vector<4x8x8xf32>
    %cst_20 = arith.constant dense<0.000000e+00> : vector<4x8xf32>
    %54 = vector.multi_reduction <add>, %53, %cst_20 [2] : vector<4x8x8xf32> to vector<4x8xf32>
    %55 = vector.shape_cast %54 : vector<4x8xf32> to vector<4x8x1xf32>
    %56 = tpu.reciprocal %55 {approx = true} : vector<4x8x1xf32> -> vector<4x8x1xf32>
    %57 = vector.broadcast %56 : vector<4x8x1xf32> to vector<4x8x8xf32>
    %58 = arith.mulf %53, %57 : vector<4x8x8xf32>
    %59 = arith.truncf %58 : vector<4x8x8xf32> to vector<4x8x8xbf16>
    "tpu.trace_start"() <{level = 10 : i32, message = "hqk,khd->qhd"}> : () -> ()
    %cst_21 = arith.constant dense<0.000000e+00> : vector<4x16x8xf32>
    %60 = tpu.matmul %44, %59, %cst_21 {dimension_numbers = #tpu.dot_dimension_numbers<[0], [2], [2], [1], [0, 1, 0, 2, 1, 1], [1], [0]>} : vector<8x4x16xbf16>, vector<4x8x8xbf16>, vector<4x16x8xf32> -> vector<4x16x8xf32>
    %61 = tpu.transpose %60, [2, 0, 1] : vector<4x16x8xf32> -> vector<8x4x16xf32>
    "tpu.trace_stop"() : () -> ()
    %62 = vector.shape_cast %61 : vector<8x4x16xf32> to vector<8x64xf32>
    %63 = arith.truncf %62 : vector<8x64xf32> to vector<8x64xbf16>
    %c64 = arith.constant 64 : index
    %c0_22 = arith.constant 0 : index
    %64 = vector.load %arg3[%c64, %c0_22] : memref<704x192xbf16, #tpu.memory_space<vmem>>, vector<64x64xbf16>
    %cst_23 = arith.constant dense<0.000000e+00> : vector<8x64xf32>
    %65 = tpu.matmul %63, %64, %cst_23 {dimension_numbers = #tpu.dot_dimension_numbers<[1], [0], [0], [1], [0, 0, 1, 1], [], []>} : vector<8x64xbf16>, vector<64x64xbf16>, vector<8x64xf32> -> vector<8x64xf32>
    %c4 = arith.constant 4 : index
    %c0_24 = arith.constant 0 : index
    %66 = vector.load %arg4[%c4, %c0_24] : memref<19x192xf32, #tpu.memory_space<vmem>>, vector<1x64xf32>
    %67 = vector.broadcast %66 : vector<1x64xf32> to vector<8x64xf32>
    %68 = arith.addf %65, %67 : vector<8x64xf32>
    %69 = arith.addf %68, %25 : vector<8x64xf32>
    %c5 = arith.constant 5 : index
    %c0_25 = arith.constant 0 : index
    %70 = vector.load %arg4[%c5, %c0_25] : memref<19x192xf32, #tpu.memory_space<vmem>>, vector<1x64xf32>
    %c6 = arith.constant 6 : index
    %c0_26 = arith.constant 0 : index
    %71 = vector.load %arg4[%c6, %c0_26] : memref<19x192xf32, #tpu.memory_space<vmem>>, vector<1x64xf32>
    %cst_27 = arith.constant dense<0.000000e+00> : vector<8xf32>
    %72 = vector.multi_reduction <add>, %69, %cst_27 [1] : vector<8x64xf32> to vector<8xf32>
    %73 = vector.shape_cast %72 : vector<8xf32> to vector<8x1xf32>
    %cst_28 = arith.constant 6.400000e+01 : f32
    %74 = vector.broadcast %cst_28 : f32 to vector<8x1xf32>
    %75 = arith.divf %73, %74 : vector<8x1xf32>
    %76 = vector.broadcast %75 : vector<8x1xf32> to vector<8x64xf32>
    %77 = arith.subf %69, %76 : vector<8x64xf32>
    %78 = arith.mulf %77, %77 : vector<8x64xf32>
    %cst_29 = arith.constant dense<0.000000e+00> : vector<8xf32>
    %79 = vector.multi_reduction <add>, %78, %cst_29 [1] : vector<8x64xf32> to vector<8xf32>
    %80 = vector.shape_cast %79 : vector<8xf32> to vector<8x1xf32>
    %cst_30 = arith.constant 6.400000e+01 : f32
    %81 = vector.broadcast %cst_30 : f32 to vector<8x1xf32>
    %82 = arith.divf %80, %81 : vector<8x1xf32>
    %83 = vector.broadcast %75 : vector<8x1xf32> to vector<8x64xf32>
    %84 = arith.subf %69, %83 : vector<8x64xf32>
    %cst_31 = arith.constant 9.99999996E-13 : f32
    %85 = vector.broadcast %cst_31 : f32 to vector<8x1xf32>
    %86 = arith.addf %82, %85 : vector<8x1xf32>
    %87 = math.rsqrt %86 : vector<8x1xf32>
    %88 = vector.broadcast %87 : vector<8x1xf32> to vector<8x64xf32>
    %89 = arith.mulf %84, %88 : vector<8x64xf32>
    %90 = vector.broadcast %70 : vector<1x64xf32> to vector<8x64xf32>
    %91 = arith.mulf %89, %90 : vector<8x64xf32>
    %92 = vector.broadcast %71 : vector<1x64xf32> to vector<8x64xf32>
    %93 = arith.addf %91, %92 : vector<8x64xf32>
    %94 = arith.truncf %93 : vector<8x64xf32> to vector<8x64xbf16>
    %c128 = arith.constant 128 : index
    %c0_32 = arith.constant 0 : index
    %95 = vector.load %arg3[%c128, %c0_32] : memref<704x192xbf16, #tpu.memory_space<vmem>>, vector<64x128xbf16>
    %cst_33 = arith.constant dense<0.000000e+00> : vector<8x128xf32>
    %96 = tpu.matmul %94, %95, %cst_33 {dimension_numbers = #tpu.dot_dimension_numbers<[1], [0], [0], [1], [0, 0, 1, 1], [], []>} : vector<8x64xbf16>, vector<64x128xbf16>, vector<8x128xf32> -> vector<8x128xf32>
    %c7 = arith.constant 7 : index
    %c0_34 = arith.constant 0 : index
    %97 = vector.load %arg4[%c7, %c0_34] : memref<19x192xf32, #tpu.memory_space<vmem>>, vector<1x128xf32>
    %98 = vector.broadcast %97 : vector<1x128xf32> to vector<8x128xf32>
    %99 = arith.addf %96, %98 : vector<8x128xf32>
    %cst_35 = arith.constant 5.000000e-01 : f32
    %100 = vector.broadcast %cst_35 : f32 to vector<8x128xf32>
    %101 = arith.mulf %100, %99 : vector<8x128xf32>
    %cst_36 = arith.constant 4.471500e-02 : f32
    %102 = vector.broadcast %cst_36 : f32 to vector<8x128xf32>
    %103 = arith.mulf %102, %99 : vector<8x128xf32>
    %104 = arith.mulf %103, %99 : vector<8x128xf32>
    %105 = arith.mulf %104, %99 : vector<8x128xf32>
    %106 = arith.addf %99, %105 : vector<8x128xf32>
    %cst_37 = arith.constant 0.797884583 : f32
    %107 = vector.broadcast %cst_37 : f32 to vector<8x128xf32>
    %108 = arith.mulf %107, %106 : vector<8x128xf32>
    %109 = math.tanh %108 : vector<8x128xf32>
    %cst_38 = arith.constant 1.000000e+00 : f32
    %110 = vector.broadcast %cst_38 : f32 to vector<8x128xf32>
    %111 = arith.addf %110, %109 : vector<8x128xf32>
    %112 = arith.mulf %101, %111 : vector<8x128xf32>
    %113 = arith.truncf %112 : vector<8x128xf32> to vector<8x128xbf16>
    %c192 = arith.constant 192 : index
    %c0_39 = arith.constant 0 : index
    %114 = vector.load %arg3[%c192, %c0_39] : memref<704x192xbf16, #tpu.memory_space<vmem>>, vector<128x64xbf16>
    %cst_40 = arith.constant dense<0.000000e+00> : vector<8x64xf32>
    %115 = tpu.matmul %113, %114, %cst_40 {dimension_numbers = #tpu.dot_dimension_numbers<[1], [0], [0], [1], [0, 0, 1, 1], [], []>} : vector<8x128xbf16>, vector<128x64xbf16>, vector<8x64xf32> -> vector<8x64xf32>
    %c8 = arith.constant 8 : index
    %c0_41 = arith.constant 0 : index
    %116 = vector.load %arg4[%c8, %c0_41] : memref<19x192xf32, #tpu.memory_space<vmem>>, vector<1x64xf32>
    %117 = vector.broadcast %116 : vector<1x64xf32> to vector<8x64xf32>
    %118 = arith.addf %115, %117 : vector<8x64xf32>
    %119 = arith.addf %118, %93 : vector<8x64xf32>
    %c9 = arith.constant 9 : index
    %c0_42 = arith.constant 0 : index
    %120 = vector.load %arg4[%c9, %c0_42] : memref<19x192xf32, #tpu.memory_space<vmem>>, vector<1x64xf32>
    %c10 = arith.constant 10 : index
    %c0_43 = arith.constant 0 : index
    %121 = vector.load %arg4[%c10, %c0_43] : memref<19x192xf32, #tpu.memory_space<vmem>>, vector<1x64xf32>
    %cst_44 = arith.constant dense<0.000000e+00> : vector<8xf32>
    %122 = vector.multi_reduction <add>, %119, %cst_44 [1] : vector<8x64xf32> to vector<8xf32>
    %123 = vector.shape_cast %122 : vector<8xf32> to vector<8x1xf32>
    %cst_45 = arith.constant 6.400000e+01 : f32
    %124 = vector.broadcast %cst_45 : f32 to vector<8x1xf32>
    %125 = arith.divf %123, %124 : vector<8x1xf32>
    %126 = vector.broadcast %125 : vector<8x1xf32> to vector<8x64xf32>
    %127 = arith.subf %119, %126 : vector<8x64xf32>
    %128 = arith.mulf %127, %127 : vector<8x64xf32>
    %cst_46 = arith.constant dense<0.000000e+00> : vector<8xf32>
    %129 = vector.multi_reduction <add>, %128, %cst_46 [1] : vector<8x64xf32> to vector<8xf32>
    %130 = vector.shape_cast %129 : vector<8xf32> to vector<8x1xf32>
    %cst_47 = arith.constant 6.400000e+01 : f32
    %131 = vector.broadcast %cst_47 : f32 to vector<8x1xf32>
    %132 = arith.divf %130, %131 : vector<8x1xf32>
    %133 = vector.broadcast %125 : vector<8x1xf32> to vector<8x64xf32>
    %134 = arith.subf %119, %133 : vector<8x64xf32>
    %cst_48 = arith.constant 9.99999996E-13 : f32
    %135 = vector.broadcast %cst_48 : f32 to vector<8x1xf32>
    %136 = arith.addf %132, %135 : vector<8x1xf32>
    %137 = math.rsqrt %136 : vector<8x1xf32>
    %138 = vector.broadcast %137 : vector<8x1xf32> to vector<8x64xf32>
    %139 = arith.mulf %134, %138 : vector<8x64xf32>
    %140 = vector.broadcast %120 : vector<1x64xf32> to vector<8x64xf32>
    %141 = arith.mulf %139, %140 : vector<8x64xf32>
    %142 = vector.broadcast %121 : vector<1x64xf32> to vector<8x64xf32>
    %143 = arith.addf %141, %142 : vector<8x64xf32>
    %144 = arith.truncf %143 : vector<8x64xf32> to vector<8x64xbf16>
    %c320 = arith.constant 320 : index
    %c0_49 = arith.constant 0 : index
    %145 = vector.load %arg3[%c320, %c0_49] : memref<704x192xbf16, #tpu.memory_space<vmem>>, vector<64x192xbf16>
    %cst_50 = arith.constant dense<0.000000e+00> : vector<8x192xf32>
    %146 = tpu.matmul %144, %145, %cst_50 {dimension_numbers = #tpu.dot_dimension_numbers<[1], [0], [0], [1], [0, 0, 1, 1], [], []>} : vector<8x64xbf16>, vector<64x192xbf16>, vector<8x192xf32> -> vector<8x192xf32>
    %c11 = arith.constant 11 : index
    %c0_51 = arith.constant 0 : index
    %147 = vector.load %arg4[%c11, %c0_51] : memref<19x192xf32, #tpu.memory_space<vmem>>, vector<1x192xf32>
    %148 = vector.broadcast %147 : vector<1x192xf32> to vector<8x192xf32>
    %149 = arith.addf %146, %148 : vector<8x192xf32>
    %150 = arith.truncf %149 : vector<8x192xf32> to vector<8x192xbf16>
    %151 = vector.extract_strided_slice %150 {offsets = [0, 0], sizes = [8, 64], strides = [1, 1]} : vector<8x192xbf16> to vector<8x64xbf16>
    %152 = vector.shape_cast %151 : vector<8x64xbf16> to vector<8x4x16xbf16>
    %153 = vector.extract_strided_slice %150 {offsets = [0, 64], sizes = [8, 64], strides = [1, 1]} : vector<8x192xbf16> to vector<8x64xbf16>
    %154 = vector.shape_cast %153 : vector<8x64xbf16> to vector<8x4x16xbf16>
    %155 = vector.extract_strided_slice %150 {offsets = [0, 128], sizes = [8, 64], strides = [1, 1]} : vector<8x192xbf16> to vector<8x64xbf16>
    %156 = vector.shape_cast %155 : vector<8x64xbf16> to vector<8x4x16xbf16>
    "tpu.trace_start"() <{level = 10 : i32, message = "qhd,khd->hqk"}> : () -> ()
    %cst_52 = arith.constant dense<0.000000e+00> : vector<4x8x8xf32>
    %157 = tpu.matmul %152, %154, %cst_52 {dimension_numbers = #tpu.dot_dimension_numbers<[2], [2], [0], [0], [0, 1, 0, 0, 1, 0], [1], [1]>} : vector<8x4x16xbf16>, vector<8x4x16xbf16>, vector<4x8x8xf32> -> vector<4x8x8xf32>
    "tpu.trace_stop"() : () -> ()
    %158 = vector.shape_cast %31 : vector<1x8xf32> to vector<1x1x8xf32>
    %159 = vector.broadcast %158 : vector<1x1x8xf32> to vector<4x8x8xf32>
    %160 = arith.addf %157, %159 : vector<4x8x8xf32>
    %cst_53 = arith.constant dense<0xFF800000> : vector<4x8xf32>
    %161 = vector.multi_reduction <maximumf>, %160, %cst_53 [2] : vector<4x8x8xf32> to vector<4x8xf32>
    %162 = vector.shape_cast %161 : vector<4x8xf32> to vector<4x8x1xf32>
    %163 = vector.broadcast %162 : vector<4x8x1xf32> to vector<4x8x8xf32>
    %164 = arith.subf %160, %163 : vector<4x8x8xf32>
    %165 = math.exp %164 : vector<4x8x8xf32>
    %cst_54 = arith.constant dense<0.000000e+00> : vector<4x8xf32>
    %166 = vector.multi_reduction <add>, %165, %cst_54 [2] : vector<4x8x8xf32> to vector<4x8xf32>
    %167 = vector.shape_cast %166 : vector<4x8xf32> to vector<4x8x1xf32>
    %168 = tpu.reciprocal %167 {approx = true} : vector<4x8x1xf32> -> vector<4x8x1xf32>
    %169 = vector.broadcast %168 : vector<4x8x1xf32> to vector<4x8x8xf32>
    %170 = arith.mulf %165, %169 : vector<4x8x8xf32>
    %171 = arith.truncf %170 : vector<4x8x8xf32> to vector<4x8x8xbf16>
    "tpu.trace_start"() <{level = 10 : i32, message = "hqk,khd->qhd"}> : () -> ()
    %cst_55 = arith.constant dense<0.000000e+00> : vector<4x16x8xf32>
    %172 = tpu.matmul %156, %171, %cst_55 {dimension_numbers = #tpu.dot_dimension_numbers<[0], [2], [2], [1], [0, 1, 0, 2, 1, 1], [1], [0]>} : vector<8x4x16xbf16>, vector<4x8x8xbf16>, vector<4x16x8xf32> -> vector<4x16x8xf32>
    %173 = tpu.transpose %172, [2, 0, 1] : vector<4x16x8xf32> -> vector<8x4x16xf32>
    "tpu.trace_stop"() : () -> ()
    %174 = vector.shape_cast %173 : vector<8x4x16xf32> to vector<8x64xf32>
    %175 = arith.truncf %174 : vector<8x64xf32> to vector<8x64xbf16>
    %c384 = arith.constant 384 : index
    %c0_56 = arith.constant 0 : index
    %176 = vector.load %arg3[%c384, %c0_56] : memref<704x192xbf16, #tpu.memory_space<vmem>>, vector<64x64xbf16>
    %cst_57 = arith.constant dense<0.000000e+00> : vector<8x64xf32>
    %177 = tpu.matmul %175, %176, %cst_57 {dimension_numbers = #tpu.dot_dimension_numbers<[1], [0], [0], [1], [0, 0, 1, 1], [], []>} : vector<8x64xbf16>, vector<64x64xbf16>, vector<8x64xf32> -> vector<8x64xf32>
    %c12 = arith.constant 12 : index
    %c0_58 = arith.constant 0 : index
    %178 = vector.load %arg4[%c12, %c0_58] : memref<19x192xf32, #tpu.memory_space<vmem>>, vector<1x64xf32>
    %179 = vector.broadcast %178 : vector<1x64xf32> to vector<8x64xf32>
    %180 = arith.addf %177, %179 : vector<8x64xf32>
    %181 = arith.addf %180, %143 : vector<8x64xf32>
    %c13 = arith.constant 13 : index
    %c0_59 = arith.constant 0 : index
    %182 = vector.load %arg4[%c13, %c0_59] : memref<19x192xf32, #tpu.memory_space<vmem>>, vector<1x64xf32>
    %c14 = arith.constant 14 : index
    %c0_60 = arith.constant 0 : index
    %183 = vector.load %arg4[%c14, %c0_60] : memref<19x192xf32, #tpu.memory_space<vmem>>, vector<1x64xf32>
    %cst_61 = arith.constant dense<0.000000e+00> : vector<8xf32>
    %184 = vector.multi_reduction <add>, %181, %cst_61 [1] : vector<8x64xf32> to vector<8xf32>
    %185 = vector.shape_cast %184 : vector<8xf32> to vector<8x1xf32>
    %cst_62 = arith.constant 6.400000e+01 : f32
    %186 = vector.broadcast %cst_62 : f32 to vector<8x1xf32>
    %187 = arith.divf %185, %186 : vector<8x1xf32>
    %188 = vector.broadcast %187 : vector<8x1xf32> to vector<8x64xf32>
    %189 = arith.subf %181, %188 : vector<8x64xf32>
    %190 = arith.mulf %189, %189 : vector<8x64xf32>
    %cst_63 = arith.constant dense<0.000000e+00> : vector<8xf32>
    %191 = vector.multi_reduction <add>, %190, %cst_63 [1] : vector<8x64xf32> to vector<8xf32>
    %192 = vector.shape_cast %191 : vector<8xf32> to vector<8x1xf32>
    %cst_64 = arith.constant 6.400000e+01 : f32
    %193 = vector.broadcast %cst_64 : f32 to vector<8x1xf32>
    %194 = arith.divf %192, %193 : vector<8x1xf32>
    %195 = vector.broadcast %187 : vector<8x1xf32> to vector<8x64xf32>
    %196 = arith.subf %181, %195 : vector<8x64xf32>
    %cst_65 = arith.constant 9.99999996E-13 : f32
    %197 = vector.broadcast %cst_65 : f32 to vector<8x1xf32>
    %198 = arith.addf %194, %197 : vector<8x1xf32>
    %199 = math.rsqrt %198 : vector<8x1xf32>
    %200 = vector.broadcast %199 : vector<8x1xf32> to vector<8x64xf32>
    %201 = arith.mulf %196, %200 : vector<8x64xf32>
    %202 = vector.broadcast %182 : vector<1x64xf32> to vector<8x64xf32>
    %203 = arith.mulf %201, %202 : vector<8x64xf32>
    %204 = vector.broadcast %183 : vector<1x64xf32> to vector<8x64xf32>
    %205 = arith.addf %203, %204 : vector<8x64xf32>
    %206 = arith.truncf %205 : vector<8x64xf32> to vector<8x64xbf16>
    %c448 = arith.constant 448 : index
    %c0_66 = arith.constant 0 : index
    %207 = vector.load %arg3[%c448, %c0_66] : memref<704x192xbf16, #tpu.memory_space<vmem>>, vector<64x128xbf16>
    %cst_67 = arith.constant dense<0.000000e+00> : vector<8x128xf32>
    %208 = tpu.matmul %206, %207, %cst_67 {dimension_numbers = #tpu.dot_dimension_numbers<[1], [0], [0], [1], [0, 0, 1, 1], [], []>} : vector<8x64xbf16>, vector<64x128xbf16>, vector<8x128xf32> -> vector<8x128xf32>
    %c15 = arith.constant 15 : index
    %c0_68 = arith.constant 0 : index
    %209 = vector.load %arg4[%c15, %c0_68] : memref<19x192xf32, #tpu.memory_space<vmem>>, vector<1x128xf32>
    %210 = vector.broadcast %209 : vector<1x128xf32> to vector<8x128xf32>
    %211 = arith.addf %208, %210 : vector<8x128xf32>
    %cst_69 = arith.constant 5.000000e-01 : f32
    %212 = vector.broadcast %cst_69 : f32 to vector<8x128xf32>
    %213 = arith.mulf %212, %211 : vector<8x128xf32>
    %cst_70 = arith.constant 4.471500e-02 : f32
    %214 = vector.broadcast %cst_70 : f32 to vector<8x128xf32>
    %215 = arith.mulf %214, %211 : vector<8x128xf32>
    %216 = arith.mulf %215, %211 : vector<8x128xf32>
    %217 = arith.mulf %216, %211 : vector<8x128xf32>
    %218 = arith.addf %211, %217 : vector<8x128xf32>
    %cst_71 = arith.constant 0.797884583 : f32
    %219 = vector.broadcast %cst_71 : f32 to vector<8x128xf32>
    %220 = arith.mulf %219, %218 : vector<8x128xf32>
    %221 = math.tanh %220 : vector<8x128xf32>
    %cst_72 = arith.constant 1.000000e+00 : f32
    %222 = vector.broadcast %cst_72 : f32 to vector<8x128xf32>
    %223 = arith.addf %222, %221 : vector<8x128xf32>
    %224 = arith.mulf %213, %223 : vector<8x128xf32>
    %225 = arith.truncf %224 : vector<8x128xf32> to vector<8x128xbf16>
    %c512 = arith.constant 512 : index
    %c0_73 = arith.constant 0 : index
    %226 = vector.load %arg3[%c512, %c0_73] : memref<704x192xbf16, #tpu.memory_space<vmem>>, vector<128x64xbf16>
    %cst_74 = arith.constant dense<0.000000e+00> : vector<8x64xf32>
    %227 = tpu.matmul %225, %226, %cst_74 {dimension_numbers = #tpu.dot_dimension_numbers<[1], [0], [0], [1], [0, 0, 1, 1], [], []>} : vector<8x128xbf16>, vector<128x64xbf16>, vector<8x64xf32> -> vector<8x64xf32>
    %c16 = arith.constant 16 : index
    %c0_75 = arith.constant 0 : index
    %228 = vector.load %arg4[%c16, %c0_75] : memref<19x192xf32, #tpu.memory_space<vmem>>, vector<1x64xf32>
    %229 = vector.broadcast %228 : vector<1x64xf32> to vector<8x64xf32>
    %230 = arith.addf %227, %229 : vector<8x64xf32>
    %231 = arith.addf %230, %205 : vector<8x64xf32>
    %c17 = arith.constant 17 : index
    %c0_76 = arith.constant 0 : index
    %232 = vector.load %arg4[%c17, %c0_76] : memref<19x192xf32, #tpu.memory_space<vmem>>, vector<1x64xf32>
    %c18 = arith.constant 18 : index
    %c0_77 = arith.constant 0 : index
    %233 = vector.load %arg4[%c18, %c0_77] : memref<19x192xf32, #tpu.memory_space<vmem>>, vector<1x64xf32>
    %cst_78 = arith.constant dense<0.000000e+00> : vector<8xf32>
    %234 = vector.multi_reduction <add>, %231, %cst_78 [1] : vector<8x64xf32> to vector<8xf32>
    %235 = vector.shape_cast %234 : vector<8xf32> to vector<8x1xf32>
    %cst_79 = arith.constant 6.400000e+01 : f32
    %236 = vector.broadcast %cst_79 : f32 to vector<8x1xf32>
    %237 = arith.divf %235, %236 : vector<8x1xf32>
    %238 = vector.broadcast %237 : vector<8x1xf32> to vector<8x64xf32>
    %239 = arith.subf %231, %238 : vector<8x64xf32>
    %240 = arith.mulf %239, %239 : vector<8x64xf32>
    %cst_80 = arith.constant dense<0.000000e+00> : vector<8xf32>
    %241 = vector.multi_reduction <add>, %240, %cst_80 [1] : vector<8x64xf32> to vector<8xf32>
    %242 = vector.shape_cast %241 : vector<8xf32> to vector<8x1xf32>
    %cst_81 = arith.constant 6.400000e+01 : f32
    %243 = vector.broadcast %cst_81 : f32 to vector<8x1xf32>
    %244 = arith.divf %242, %243 : vector<8x1xf32>
    %245 = vector.broadcast %237 : vector<8x1xf32> to vector<8x64xf32>
    %246 = arith.subf %231, %245 : vector<8x64xf32>
    %cst_82 = arith.constant 9.99999996E-13 : f32
    %247 = vector.broadcast %cst_82 : f32 to vector<8x1xf32>
    %248 = arith.addf %244, %247 : vector<8x1xf32>
    %249 = math.rsqrt %248 : vector<8x1xf32>
    %250 = vector.broadcast %249 : vector<8x1xf32> to vector<8x64xf32>
    %251 = arith.mulf %246, %250 : vector<8x64xf32>
    %252 = vector.broadcast %232 : vector<1x64xf32> to vector<8x64xf32>
    %253 = arith.mulf %251, %252 : vector<8x64xf32>
    %254 = vector.broadcast %233 : vector<1x64xf32> to vector<8x64xf32>
    %255 = arith.addf %253, %254 : vector<8x64xf32>
    %256 = arith.truncf %255 : vector<8x64xf32> to vector<8x64xbf16>
    %c640 = arith.constant 640 : index
    %c0_83 = arith.constant 0 : index
    %257 = vector.load %arg3[%c640, %c0_83] : memref<704x192xbf16, #tpu.memory_space<vmem>>, vector<64x128xbf16>
    %cst_84 = arith.constant dense<0.000000e+00> : vector<8x128xf32>
    %258 = tpu.matmul %256, %257, %cst_84 {dimension_numbers = #tpu.dot_dimension_numbers<[1], [0], [0], [1], [0, 0, 1, 1], [], []>} : vector<8x64xbf16>, vector<64x128xbf16>, vector<8x128xf32> -> vector<8x128xf32>
    %c2 = arith.constant 2 : index
    %c0_85 = arith.constant 0 : index
    %259 = vector.load %arg4[%c2, %c0_85] : memref<19x192xf32, #tpu.memory_space<vmem>>, vector<1x128xf32>
    %260 = vector.broadcast %259 : vector<1x128xf32> to vector<8x128xf32>
    %261 = arith.addf %258, %260 : vector<8x128xf32>
    %c0_86 = arith.constant 0 : index
    %c0_87 = arith.constant 0 : index
    %c0_88 = arith.constant 0 : index
    %262 = vector.load %arg5[%c0_86, %c0_87, %c0_88] : memref<1x8x128xf32, #tpu.memory_space<vmem>>, vector<1x8x128xf32>
    %263 = vector.shape_cast %262 : vector<1x8x128xf32> to vector<8x128xf32>
    %264 = vector.shape_cast %261 : vector<8x128xf32> to vector<1x8x128xf32>
    tpu.vector_store %arg5[%c0_86, %c0_87, %c0_88], %264 {strides = array<i32>} : memref<1x8x128xf32, #tpu.memory_space<vmem>>, vector<1x8x128xf32>,
    return
  }
  func.func @transform_0(%arg0: i32) -> (i32, i32, i32) {
    %c0_i32 = arith.constant 0 : i32
    %c0_i32_0 = arith.constant 0 : i32
    %c0_i32_1 = arith.constant 0 : i32
    return %arg0, %c0_i32, %c0_i32_0 : i32, i32, i32
  }
  func.func @transform_1(%arg0: i32) -> (i32, i32, i32) {
    %c0_i32 = arith.constant 0 : i32
    %c0_i32_0 = arith.constant 0 : i32
    %c0_i32_1 = arith.constant 0 : i32
    return %arg0, %c0_i32, %c0_i32_0 : i32, i32, i32
  }
  func.func @transform_2(%arg0: i32) -> (i32, i32) {
    %c0_i32 = arith.constant 0 : i32
    %c0_i32_0 = arith.constant 0 : i32
    %c0_i32_1 = arith.constant 0 : i32
    return %c0_i32, %c0_i32_0 : i32, i32
  }
  func.func @transform_3(%arg0: i32) -> (i32, i32) {
    %c0_i32 = arith.constant 0 : i32
    %c0_i32_0 = arith.constant 0 : i32
    %c0_i32_1 = arith.constant 0 : i32
    return %c0_i32, %c0_i32_0 : i32, i32
  }
  func.func @transform_4(%arg0: i32) -> (i32, i32, i32) {
    %c0_i32 = arith.constant 0 : i32
    %c0_i32_0 = arith.constant 0 : i32
    %c0_i32_1 = arith.constant 0 : i32
    return %arg0, %c0_i32, %c0_i32_0 : i32, i32, i32
  }
}

</mosaic_0001>

<bundles_post_ra>
// kernel: bert_classifier_forward.1
= control target key start
LH: loop header
LB: loop body
LE: loop exit
PB: predicated region body
PF: predicated region fallthrough
CT: control target
= control target key end

     0   :  { %s3428_s15 = smov 0   ;;  %s3943_s0 = inlined_call_operand.vmem [shape: f32[2,8,64], index: 0, kind: input, shape index: {}]   ;;  %s3944_s1 = inlined_call_operand.vmem [shape: f32[2,1,8], index: 1, kind: input, shape index: {}]   ;;  %s3945_s2 = inlined_call_operand.vmem [shape: bf16[704,192], index: 2, kind: input, shape index: {}]   ;;  %s3946_s3 = inlined_call_operand.vmem [shape: f32[19,192], index: 3, kind: input, shape index: {}]   ;;  %s3947_s4 = inlined_call_operand.vmem [shape: f32[2,8,128], index: 4, kind: output, shape index: {}]  }
   0x1 LB: > { %s2895_s16 = sadd.s32 4294967295, %s3389_s15   ;;  %p2899_p0 = scmp.ge.s32.totalorder %s3389_s15, 1  ;;  %s3389_s15 = sphi %s3428_s15, %s14_s15  }
   0x2   : > { %p169_p1 = scmp.lt.s32.totalorder %s3389_s15, 3 }
   0x4   : > { %p170_p2 = pnand %p2899_p0, %p169_p1 }
   0x5   : > { %p196_p3 = scmp.lt.s32.totalorder (!%p170_p2), %s2895_s16, 1  ;;  %vm211_vm0 = vcmask (!%p170_p2), 523264   ;;  %v3277_v7 = vld [vmem:[%s3945_s2 + $0x4] ss:$8 sps:$4 sm:$0xff] (!%p170_p2)   ;;  %v3279_v8 = vld [vmem:[%s3945_s2] ss:$8 sps:$4 sm:$0xff] (!%p170_p2)   ;;  %v243_v26 = vlaneseq (!%p170_p2) }
   0x6   : > { %173 = sbr.rel (%p170_p2) target bundleno = 6475 (0x194b), region = 36  ;;  %296 = vmatprep.subr.bf16.mxu0 (!%p170_p2), %v3277_v7  ;;  %v3280_v9 = vld [vmem:[%s3945_s2 + $0x14] ss:$8 sps:$4 sm:$0xff] (!%p170_p2)   ;;  %v3282_v10 = vld [vmem:[%s3945_s2 + $0x10] ss:$8 sps:$4 sm:$0xff] (!%p170_p2)   ;;  %v3391_v15 = vmov (!%p170_p2), 0  }
   0x7   : > { %297 = vmatpush1.bf16.msra.mxu0 (!%p170_p2), %v3279_v8  ;;  %v3283_v11 = vld [vmem:[%s3945_s2 + $0x24] ss:$8 sps:$4 sm:$0xff] (!%p170_p2)   ;;  %v3285_v12 = vld [vmem:[%s3945_s2 + $0x20] ss:$8 sps:$4 sm:$0xff] (!%p170_p2)   ;;  %v3286_v13 = vld [vmem:[%s3945_s2 + $0x34] ss:$8 sps:$4 sm:$0xff] (!%p170_p2)   ;;  %328 = vmatprep.mubr.bf16.mxu0 (!%p170_p2), %v3391_v15 }
   0x8   : > { %298 = vmatprep.subr.bf16.mxu0 (!%p170_p2), %v3280_v9  ;;  %v3288_v14 = vld [vmem:[%s3945_s2 + $0x30] ss:$8 sps:$4 sm:$0xff] (!%p170_p2)   ;;  %v209_v20 = vld [vmem:[%s3946_s3] ss:$0 sm:$0xff] (!%p170_p2)  ;;  %v210_v22 = vld [vmem:[%s3946_s3 + $0x1] ss:$0 sm:$0xff] (!%p170_p2) }
   0x9   : > { %v3482_v27 = vshrl.u32 (!%p170_p2), %v243_v26, 7  ;;  %v3490_v29 = vld [vmem:[%s3946_s3 + $0x3] ss:$8 sm:$0x3] (!%p170_p2)  ;;  %s3393_s21 = smov (!%p170_p2), 112   ;;  %s3394_s22 = smov (!%p170_p2), 96  }
   0xa   : > { %s3395_s23 = smov (!%p170_p2), 64   ;;  %v3396_v37 = vmov (!%p170_p2), 0.0   ;;  %vm3397_vm1 = vmmov (!%p170_p2), 0   ;;  %vm438_vm2 = vcmask (!%p170_p2), 130048   ;;  %vm611_vm3 = vcmask (!%p170_p2), 64512   ;;  %s3400_s9 = smov (!%p170_p2), 32  }
   0xb   : > { %299 = vmatpush1.bf16.msra.mxu0 (!%p170_p2), %v3282_v10  ;;  %v3485_v28 = vsub.s32 (!%p170_p2), 0, %v3482_v27  ;;  %3067 = vmatprep.subr.bf16.mxu1 (!%p170_p2), %v3396_v37  ;;  %s3401_s10 = smov (!%p170_p2), 16   ;;  %s3402_s11 = smov (!%p170_p2), 48   ;;  %vm1189_vm4 = vcmask (!%p170_p2), 261120   ;;  %vm1191_vm5 = vcmask (!%p170_p2), 392192  }
   0xc   : > { %300 = vmatprep.subr.bf16.mxu0 (!%p170_p2), %v3283_v11  ;;  %3069 = vmatprep.mubr.msk.bf16.mxu1 (!%p170_p2), %vm3397_vm1, %v3396_v37 }
   0xd   : > { %s3949_s16 = smov (!%p196_p3, %s2895_s16), 1  ;;  %v246_v30 = vrot.slane %v3490_v29, %v3485_v28 }
   0xe   : > { %s2900_s17 = sshll.u32 %s3949_s16, 3  ;;  %s202_s26 = scalar_lea.vmem %s3944_s1, %s3949_s16 }
   0xf   : > { %s199_s20 = scalar_lea.vmem %s3943_s0, %s2900_s17  ;;  %301 = vmatpush1.bf16.msra.mxu0 %v3285_v12  ;;  %v228_v49 = vld [vmem:[%s202_s26] sm:$0x1]  ;;  %s206_s6 = scalar_lea.vmem %s3947_s4, %s2900_s17 }
  0x10   : > { %v208_v0 = vld [vmem:[%s199_s20] sm:$0xff]  ;;  %302 = vmatprep.subr.bf16.mxu0 %v3286_v13  ;;  %s3392_s20 = smov 80   ;;  %v2902_v50 = vadd.f32 -1.0, %v228_v49  ;;  %v249_v13 = vsub.s32 1, %v3482_v27 }
  0x11   : > { %v212_v1 = vsel %vm211_vm0, %v208_v0, 0.0 }
  0x12   : > { %213 = vadd.xlane.f32.xlu0 %v212_v1  ;;  %v230_v51 = vmul.f32 1e+09, %v2902_v50 }
  0x13   : > { %303 = vmatpush1.bf16.msra.mxu0 %v3288_v14  ;;  %v250_v14 = vrot.slane %v3490_v29, %v249_v13 }
  0x14   : > { %3061 = vmatprep.subr.bf16.mxu0 %v3396_v37  ;;  %v3530_v52 = vrot.slane %v230_v51, %v3485_v28 }
  0x9f   : > { %v214_v2 = vpop.xlane.xlu0 %213 }
  0xa0   : > { %v216_v3 = vmul.f32 0.015625, %v214_v2 }
  0xa2   : > { %v217_v4 = vsub.f32 %v208_v0, %v216_v3 }
  0xa4   : > { %v218_v5 = vmul.f32 %v217_v4, %v217_v4 }
  0xa6   : > { %v219_v6 = vsel %vm211_vm0, %v218_v5, 0.0 }
  0xa7   : > { %220 = vadd.xlane.f32.xlu0 %v219_v6 }
 0x134   : > { %v221_v16 = vpop.xlane.xlu0 %220 }
 0x135   : > { %v222_v17 = vmul.f32 0.015625, %v221_v16 }
 0x137   : > { %v223_v18 = vadd.f32 1e-12, %v222_v17 }
 0x139   : > { %3337 = vrsqrt.f32 %v223_v18 }
 0x143   : > { %v3338_v19 = vpop.eup %3337 }
 0x144   : > { %v225_v21 = vmul.f32 %v3338_v19, %v217_v4 }
 0x146   : > { %v226_v23 = vmul.f32 %v225_v21, %v209_v20 }
 0x148   : > { %v3477_v24 = vadd.f32 %v226_v23, %v210_v22 }
 0x14a   : > { %v231_v25 = vpack.c.bf16 %v3477_v24, %v3477_v24 }
 0x14c   : > { %2912 = vmatmul.mubr.msk.bf16.vlgmr.msra.gmra.mrb[0].mxu0 %vm211_vm0, %v231_v25 }
 0x14d   : > { %3063 = vmatprep.mubr.msk.bf16.mxu0 %vm3397_vm1, %v3396_v37 }
 0x21f   : > { %v330_v31 = vpop.f32.mrb[0].mxu0 }
 0x220   : > { %v331_v32 = vadd.f32 %v330_v31, %v246_v30  ;;  %v3494_v33 = vpop.f32.mrb[1].mxu0 }
 0x221   : > { %v334_v34 = vpop.f32.mrb[2].mxu0  ;;  %v333_v16 = vadd.f32 %v3494_v33, %v250_v14 }
 0x222   : > { %v337_v35 = vpack.c.bf16 %v331_v32, %v331_v32  ;;  %v335_v36 = vpop.f32.mrb[3].mxu0 }
 0x223   : > { %v338_v17 = vpack.c.bf16 %v333_v16, %v333_v16 }
 0x224   : > { %344 = vrot.lane.b32.xlu0 %v337_v35, %s3392_s20  ;;  %340 = vrot.lane.b32.xlu1 %v337_v35, %s3393_s21 }
 0x228   : > { %342 = vrot.lane.b32.xlu1 %v337_v35, %s3394_s22 }
 0x22c   : > { %362 = vrot.lane.b32.xlu1 %v337_v35, %s3395_s23 }
 0x296   : > { %v341_v38 = vpop.permute.xlu1 %340  ;;  %v345_v40 = vpop.permute.xlu0 %344 }
 0x297   : > { %364 = vrot.lane.b32.xlu1 %v341_v38, %s3395_s23 }
 0x29a   : > { %v343_v39 = vpop.permute.xlu1 %342 }
 0x29b   : > { %366 = vrot.lane.b32.xlu1 %v343_v39, %s3395_s23 }
 0x29e   : > { %v363_v41 = vpop.permute.xlu1 %362 }
 0x29f   : > { %368 = vrot.lane.b32.xlu1 %v345_v40, %s3395_s23 }
 0x2c2   : > { %374 = vxpose.xlu1.c.b16.start.end [1/1] (short) (narrow) %v363_v41, 16 }
 0x309   : > { %v365_v42 = vpop.permute.xlu1 %364 }
 0x30a   : > { %390 = vxpose.xlu0.c.b16.start.end [1/1] (short) (narrow) %v365_v42, 16 }
 0x30d   : > { %v367_v43 = vpop.permute.xlu1 %366 }
 0x30e   : > { %406 = vxpose.xlu1.c.b16.start.end [1/1] (short) (narrow) %v367_v43, 16 }
 0x311   : > { %v369_v44 = vpop.permute.xlu1 %368 }
 0x312   : > { %422 = vxpose.xlu0.c.b16.start.end [1/1] (short) (narrow) %v369_v44, 16 }
 0x328   : > { %v382_v45 = vpop.trf.xlu1 }
 0x329   : > { %3062 = vmatpush3.bf16.msra.mxu0 %v382_v45 }
 0x32a   : > { %3079 = vmatprep.subr.bf16.mxu0 %v3396_v37 }
 0x32c   : > { %3064 = vmatmul.mubr.msk.bf16.vlgmr.msra.gmra.mrb[4].mxu0 %vm438_vm2, %v337_v35 }
 0x32d   : > { %3081 = vmatprep.mubr.msk.bf16.mxu0 %vm3397_vm1, %v3396_v37 }
 0x370   : > { %v398_v46 = vpop.trf.xlu0 }
 0x371   : > { %3068 = vmatpush3.bf16.msra.mxu1 %v398_v46 }
 0x372   : > { %3073 = vmatprep.subr.bf16.mxu1 %v3396_v37 }
 0x374   : > { %3070 = vmatmul.mubr.msk.bf16.vlgmr.msra.gmra.mrb[0].mxu1 %vm438_vm2, %v341_v38  ;;  %v414_v47 = vpop.trf.xlu1 }
 0x375   : > { %3074 = vmatpush3.bf16.msra.mxu1 %v414_v47  ;;  %3075 = vmatprep.mubr.msk.bf16.mxu1 %vm3397_vm1, %v3396_v37 }
 0x376   : > { %3085 = vmatprep.subr.bf16.mxu1 %v3396_v37 }
 0x378   : > { %v430_v48 = vpop.trf.xlu0 }
 0x379   : > { %3080 = vmatpush3.bf16.msra.mxu0 %v430_v48 }
 0x37a   : > { %3091 = vmatprep.subr.bf16.mxu0 %v3396_v37 }
 0x37c   : > { %3076 = vmatmul.mubr.msk.bf16.vlgmr.msra.gmra.mrb[4].mxu1 %vm438_vm2, %v343_v39  ;;  %3082 = vmatmul.mubr.msk.bf16.vlgmr.msra.gmra.mrb[8].mxu0 %vm438_vm2, %v345_v40 }
 0x37d   : > { %3087 = vmatprep.mubr.msk.bf16.mxu1 %vm3397_vm1, %v3396_v37  ;;  %3093 = vmatprep.mubr.msk.bf16.mxu0 %vm3397_vm1, %v3396_v37 }
 0x3ff   : > { %v476_v53 = vpop.f32.mrb[4].mxu0 }
 0x400   : > { %v477_v54 = vadd.f32 %v476_v53, %v3530_v52  ;;  %v3065_v55 = vpop.f32.mrb[5].mxu0 }
 0x401   : > { %v479_v56 = vpop.f32.mrb[6].mxu0 }
 0x402   : > { %v3066_v57 = vpop.f32.mrb[7].mxu0  ;;  %v612_v58 = vsel %vm611_vm3, %v477_v54, -inf }
 0x403   : > { %613 = vmax.xlane.f32.xlu1 %v612_v58 }
 0x447   : > { %v519_v59 = vpop.f32.mrb[0].mxu1 }
 0x448   : > { %v520_v60 = vadd.f32 %v519_v59, %v3530_v52  ;;  %v3071_v61 = vpop.f32.mrb[1].mxu1 }
 0x449   : > { %v522_v62 = vpop.f32.mrb[2].mxu1 }
 0x44a   : > { %v3072_v63 = vpop.f32.mrb[3].mxu1  ;;  %v615_v0 = vsel %vm611_vm3, %v520_v60, -inf }
 0x44b   : > { %616 = vmax.xlane.f32.xlu0 %v615_v0 }
 0x44f   : > { %v562_v1 = vpop.f32.mrb[4].mxu1  ;;  %v605_v2 = vpop.f32.mrb[8].mxu0 }
 0x450   : > { %v563_v3 = vadd.f32 %v562_v1, %v3530_v52  ;;  %v606_v4 = vadd.f32 %v605_v2, %v3530_v52  ;;  %v3077_v5 = vpop.f32.mrb[5].mxu1  ;;  %v3083_v6 = vpop.f32.mrb[9].mxu0 }
 0x451   : > { %v565_v7 = vpop.f32.mrb[6].mxu1  ;;  %v608_v8 = vpop.f32.mrb[10].mxu0 }
 0x452   : > { %v3078_v9 = vpop.f32.mrb[7].mxu1  ;;  %v3084_v10 = vpop.f32.mrb[11].mxu0  ;;  %v621_v11 = vsel %vm611_vm3, %v606_v4, -inf  ;;  %v618_v12 = vsel %vm611_vm3, %v563_v3, -inf }
 0x453   : > { %622 = vmax.xlane.f32.xlu0 %v621_v11  ;;  %619 = vmax.xlane.f32.xlu1 %v618_v12 }
 0x464   : > { %347 = vrot.lane.b32.xlu1 %v338_v17, %s3393_s21 }
 0x468   : > { %353 = vrot.lane.b32.xlu1 %v338_v17, %s3392_s20 }
 0x490   : > { %v614_v18 = vpop.xlane.xlu1 %613 }
 0x491   : > { %v624_v19 = vsub.f32 %v477_v54, %v614_v18 }
 0x493   : > { %v628_v20 = vmul.f32 1.442695, %v624_v19 }
 0x495   : > { %3339 = vpow2.f32 %v628_v20 }
 0x49f   : > { %v3340_v21 = vpop.eup %3339 }
 0x4a0   : > { %v636_v22 = vsel %vm611_vm3, %v3340_v21, 0.0 }
 0x4a1   : > { %637 = vadd.xlane.f32.xlu0 %v636_v22 }
 0x4d8   : > { %v617_v23 = vpop.xlane.xlu0 %616 }
 0x4d9   : > { %v625_v25 = vsub.f32 %v520_v60, %v617_v23 }
 0x4db   : > { %v630_v26 = vmul.f32 1.442695, %v625_v25  ;;  %v3289_v25 = vld [vmem:[%s3945_s2 + $0x40] ss:$8 sps:$4 sm:$0xff]  }
 0x4dd   : > { %3341 = vpow2.f32 %v630_v26  ;;  %v3290_v26 = vld [vmem:[%s3945_s2 + $0x50] ss:$8 sps:$4 sm:$0xff]  }
 0x4e0   : > { %v620_v29 = vpop.xlane.xlu1 %619  ;;  %v623_v36 = vpop.xlane.xlu0 %622 }
 0x4e1   : > { %v626_v30 = vsub.f32 %v563_v3, %v620_v29  ;;  %v627_v38 = vsub.f32 %v606_v4, %v623_v36 }
 0x4e3   : > { %v632_v31 = vmul.f32 1.442695, %v626_v30  ;;  %v634_v39 = vmul.f32 1.442695, %v627_v38  ;;  %v3398_v30 = vmov 1983009808  }
 0x4e4   : > { %v348_v47 = vpop.permute.xlu1 %347 }
 0x4e5   : > { %3343 = vpow2.f32 %v632_v31  ;;  %v1043_v31 = vunpack.c.l.s4 %v3398_v30 }
 0x4e6   : > { %3345 = vpow2.f32 %v634_v39 }
 0x4e7   : > { %v3342_v32 = vpop.eup %3341 }
 0x4e8   : > { %v639_v33 = vsel %vm611_vm3, %v3342_v32, 0.0  ;;  %v354_v50 = vpop.permute.xlu1 %353 }
 0x4e9   : > { %640 = vadd.xlane.f32.xlu0 %v639_v33 }
 0x4ef   : > { %v3344_v34 = vpop.eup %3343 }
 0x4f0   : > { %v642_v35 = vsel %vm611_vm3, %v3344_v34, 0.0  ;;  %v3346_v40 = vpop.eup %3345 }
 0x4f1   : > { %643 = vadd.xlane.f32.xlu1 %v642_v35  ;;  %v645_v41 = vsel %vm611_vm3, %v3346_v40, 0.0 }
 0x4ff   : > { %350 = vrot.lane.b32.xlu0 %v338_v17, %s3394_s22 }
 0x51e   : > { %646 = vadd.xlane.f32.xlu0 %v645_v41  ;;  %660 = vxpose.xlu1.c.b16.start.end [1/1] (short) (narrow) %v338_v17, 16 }
 0x52e   : > { %v638_v42 = vpop.xlane.xlu0 %637 }
 0x52f   : > { %3347 = vrcp.f32 %v638_v42 }
 0x539   : > { %v3348_v43 = vpop.eup %3347 }
 0x53a   : > { %v652_v44 = vmul.f32 %v3348_v43, %v3340_v21 }
 0x53c   : > { %v656_v45 = vpack.c.bf16 %v652_v44, %v652_v44 }
 0x53e   : > { %v728_v46 = vsel %vm611_vm3, %v656_v45, 0 }
 0x53f   : > { %3086 = vmatpush3.bf16.xpose.msra.mxu1 %v728_v46 }
 0x540   : > { %3097 = vmatprep.subr.bf16.mxu1 %v3396_v37 }
 0x54b   : > { %676 = vxpose.xlu0.c.b16.start.end [1/1] (short) (narrow) %v348_v47, 16 }
 0x576   : > { %v641_v48 = vpop.xlane.xlu0 %640 }
 0x577   : > { %3349 = vrcp.f32 %v641_v48 }
 0x57a   : > { %v351_v49 = vpop.permute.xlu0 %350 }
 0x57b   : > { %692 = vxpose.xlu1.c.b16.start.end [1/1] (short) (narrow) %v351_v49, 16 }
 0x57e   : > { %v644_v51 = vpop.xlane.xlu1 %643 }
 0x57f   : > { %708 = vxpose.xlu1.c.b16.start.end [1/1] (short) (narrow) %v354_v50, 16  ;;  %3351 = vrcp.f32 %v644_v51 }
 0x581   : > { %v3350_v53 = vpop.eup %3349 }
 0x582   : > { %v653_v54 = vmul.f32 %v3350_v53, %v3342_v32  ;;  %v3399_v32 = vmov 1934713408  }
 0x583   : > { %v1075_v33 = vunpack.c.l.s4 %v3399_v32 }
 0x584   : > { %v657_v55 = vpack.c.bf16 %v653_v54, %v653_v54  ;;  %v668_v56 = vpop.trf.xlu1 }
 0x585   : > { %3088 = vmatmul.mubr.msk.bf16.vlgmr.msra.gmra.mrb[8].mxu1 %vm611_vm3, %v668_v56  ;;  %v1076_v36 = vunpack.c.0.s8 %v1075_v33 }
 0x586   : > { %v775_v57 = vsel %vm611_vm3, %v657_v55, 0  ;;  %3099 = vmatprep.mubr.msk.bf16.mxu1 %vm3397_vm1, %v3396_v37  ;;  %v3291_v55 = vld [vmem:[%s3945_s2 + $0x60] ss:$8 sps:$4 sm:$0xff]  }
 0x587   : > { %3092 = vmatpush3.bf16.xpose.msra.mxu0 %v775_v57  ;;  %v3584_v45 = vsub.s32 %v1076_v36, %v3482_v27 }
 0x588   : > { %3103 = vmatprep.subr.bf16.mxu0 %v3396_v37 }
 0x589   : > { %v3352_v58 = vpop.eup %3351 }
 0x58a   : > { %v654_v59 = vmul.f32 %v3352_v58, %v3344_v34  ;;  %v1044_v34 = vunpack.c.0.s8 %v1043_v31 }
 0x58c   : > { %v658_v60 = vpack.c.bf16 %v654_v59, %v654_v59  ;;  %v3581_v39 = vsub.s32 %v1044_v34, %v3482_v27 }
 0x58e   : > { %v822_v61 = vsel %vm611_vm3, %v658_v60, 0 }
 0x58f   : > { %3098 = vmatpush3.bf16.xpose.msra.mxu1 %v822_v61 }
 0x590   : > { %3109 = vmatprep.subr.bf16.mxu1 %v3396_v37 }
 0x5ab   : > { %v647_v62 = vpop.xlane.xlu0 %646 }
 0x5ac   : > { %3353 = vrcp.f32 %v647_v62 }
 0x5b1   : > { %v684_v63 = vpop.trf.xlu0 }
 0x5b2   : > { %3094 = vmatmul.mubr.msk.bf16.vlgmr.msra.gmra.mrb[12].mxu0 %vm611_vm3, %v684_v63 }
 0x5b3   : > { %3105 = vmatprep.mubr.msk.bf16.mxu0 %vm3397_vm1, %v3396_v37 }
 0x5b6   : > { %v3354_v0 = vpop.eup %3353 }
 0x5b7   : > { %v655_v1 = vmul.f32 %v3354_v0, %v3346_v40  ;;  %v3292_v0 = vld [vmem:[%s3945_s2 + $0x70] ss:$8 sps:$4 sm:$0xff]  }
 0x5b9   : > { %v659_v2 = vpack.c.bf16 %v655_v1, %v655_v1 }
 0x5bb   : > { %v869_v3 = vsel %vm611_vm3, %v659_v2, 0 }
 0x5bc   : > { %3104 = vmatpush3.bf16.xpose.msra.mxu0 %v869_v3 }
 0x5bd   : > { %3121 = vmatprep.subr.bf16.mxu0 %v3396_v37 }
 0x5e1   : > { %v700_v4 = vpop.trf.xlu1 }
 0x5e2   : > { %3100 = vmatmul.mubr.msk.bf16.vlgmr.msra.gmra.mrb[12].mxu1 %vm611_vm3, %v700_v4 }
 0x5e3   : > { %3117 = vmatprep.mubr.msk.bf16.mxu1 %vm3397_vm1, %v3396_v37  ;;  %3110 = vmatpush3.bf16.msra.mxu1 %v3289_v25 }
 0x5e4   : > { %3111 = vmatprep.subr.bf16.mxu1 %v3396_v37 }
 0x5e5   : > { %v716_v5 = vpop.trf.xlu1 }
 0x5e6   : > { %3106 = vmatmul.mubr.msk.bf16.vlgmr.msra.gmra.mrb[16].mxu0 %vm611_vm3, %v716_v5 }
 0x5e7   : > { %3129 = vmatprep.mubr.msk.bf16.mxu0 %vm3397_vm1, %v3396_v37  ;;  %3112 = vmatpush3.bf16.msra.mxu1 %v3290_v26 }
 0x5e8   : > { %3113 = vmatprep.subr.bf16.mxu1 %v3396_v37 }
 0x5eb   : > { %3114 = vmatpush3.bf16.msra.mxu1 %v3291_v55 }
 0x5ec   : > { %3115 = vmatprep.subr.bf16.mxu1 %v3396_v37 }
 0x5ef   : > { %3116 = vmatpush3.bf16.msra.mxu1 %v3292_v0  ;;  %v3303_v0 = vld [vmem:[%s3945_s2 + $0x120] ss:$8 sps:$4 sm:$0xff]  }
 0x5f0   : > { %3133 = vmatprep.subr.bf16.mxu1 %v3396_v37 }
 0x658   : > { %v764_v6 = vpop.f32.mrb[8].mxu1 }
 0x659   : > { %912 = vxpose.xlu0.b32.start [1/2] (short) (narrow) %v764_v6, 8  ;;  %v3089_v7 = vpop.f32.mrb[9].mxu1 }
 0x65a   : > { %v767_v8 = vpop.f32.mrb[10].mxu1 }
 0x65b   : > { %v3090_v9 = vpop.f32.mrb[11].mxu1 }
 0x65d   : > { %913 = vxpose.xlu0.b32.end [2/2] (short) (narrow) %v767_v8, 8 }
 0x685   : > { %v811_v10 = vpop.f32.mrb[12].mxu0 }
 0x686   : > { %944 = vxpose.xlu1.b32.start [1/2] (short) (narrow) %v811_v10, 8  ;;  %v3095_v11 = vpop.f32.mrb[13].mxu0 }
 0x687   : > { %v814_v12 = vpop.f32.mrb[14].mxu0 }
 0x688   : > { %v3096_v14 = vpop.f32.mrb[15].mxu0 }
 0x68a   : > { %945 = vxpose.xlu1.b32.end [2/2] (short) (narrow) %v814_v12, 8 }
 0x6b5   : > { %v858_v16 = vpop.f32.mrb[12].mxu1 }
 0x6b6   : > { %976 = vxpose.xlu0.b32.start [1/2] (short) (narrow) %v858_v16, 8  ;;  %v3101_v17 = vpop.f32.mrb[13].mxu1 }
 0x6b7   : > { %v861_v18 = vpop.f32.mrb[14].mxu1 }
 0x6b8   : > { %v3102_v19 = vpop.f32.mrb[15].mxu1 }
 0x6b9   : > { %v905_v20 = vpop.f32.mrb[16].mxu0 }
 0x6ba   : > { %977 = vxpose.xlu0.b32.end [2/2] (short) (narrow) %v861_v18, 8  ;;  %v3107_v21 = vpop.f32.mrb[17].mxu0 }
 0x6bb   : > { %v908_v22 = vpop.f32.mrb[18].mxu0 }
 0x6bc   : > { %v3108_v23 = vpop.f32.mrb[19].mxu0 }
 0x6be   : > { %1008 = vxpose.xlu0.b32.start [1/2] (short) (narrow) %v905_v20, 8 }
 0x6c2   : > { %1009 = vxpose.xlu0.b32.end [2/2] (short) (narrow) %v908_v22, 8 }
 0x6d9   : > { %v928_v29 = vpop.trf.xlu0 }
 0x706   : > { %v960_v38 = vpop.trf.xlu1 }
 0x736   : > { %v992_v35 = vpop.trf.xlu0 }
 0x737   : > { %v1040_v40 = vcombine.low %v928_v29, %v992_v35  ;;  %v1041_v41 = vcombine.high %v928_v29, %v992_v35  ;;  %v1202_v29 = vld [vmem:[%s3946_s3 + $0x4] ss:$0 sm:$0xff] }
 0x739   : > { %v1048_v46 = vrot.slane %v1040_v40, %v3581_v39  ;;  %v1055_v47 = vrot.slane %v1041_v41, %v3581_v39 }
 0x73e   : > { %v1024_v42 = vpop.trf.xlu0 }
 0x73f   : > { %v1056_v43 = vcombine.low %v960_v38, %v1024_v42  ;;  %v1057_v44 = vcombine.high %v960_v38, %v1024_v42 }
 0x741   : > { %v1064_v48 = vrot.slane %v1056_v43, %v3581_v39  ;;  %v1071_v49 = vrot.slane %v1057_v44, %v3581_v39  ;;  %v3293_v44 = vld [vmem:[%s3945_s2 + $0x80] ss:$8 sps:$4 sm:$0xff]  }
 0x742   : > { %3122 = vmatpush3.bf16.msra.mxu0 %v3293_v44  ;;  %v3314_v44 = vld [vmem:[%s3945_s2 + $0x170] ss:$8 sps:$4 sm:$0xff]  }
 0x743   : > { %v1072_v50 = vcombine.low %v1048_v46, %v1064_v48  ;;  %v1073_v51 = vcombine.high %v1048_v46, %v1064_v48  ;;  %v1088_v53 = vcombine.low %v1055_v47, %v1071_v49  ;;  %v1089_v54 = vcombine.high %v1055_v47, %v1071_v49  ;;  %3123 = vmatprep.subr.bf16.mxu0 %v3396_v37  ;;  %v3295_v46 = vld [vmem:[%s3945_s2 + $0xa0] ss:$8 sps:$4 sm:$0xff]   ;;  %v3296_v47 = vld [vmem:[%s3945_s2 + $0xb0] ss:$8 sps:$4 sm:$0xff]  }
 0x744   : > { %v3297_v48 = vld [vmem:[%s3945_s2 + $0xc0] ss:$8 sps:$4 sm:$0xff]  }
 0x745   : > { %v1080_v56 = vrot.slane %v1072_v50, %v3584_v45  ;;  %v1087_v57 = vrot.slane %v1073_v51, %v3584_v45  ;;  %v1096_v58 = vrot.slane %v1088_v53, %v3584_v45  ;;  %v1103_v59 = vrot.slane %v1089_v54, %v3584_v45  ;;  %v1271_v54 = vld [vmem:[%s3946_s3 + $0x5] ss:$0 sm:$0xff] }
 0x747   : > { %v1108_v60 = vcombine.low %v1080_v56, %v1087_v57  ;;  %v2921_v61 = vcombine.high %v1080_v56, %v1087_v57  ;;  %v1124_v62 = vcombine.low %v1096_v58, %v1103_v59  ;;  %v2922_v63 = vcombine.high %v1096_v58, %v1103_v59  ;;  %v1272_v56 = vld [vmem:[%s3946_s3 + $0x6] ss:$0 sm:$0xff] }
 0x749   : > { %v1115_v1 = vrot.slane %v1108_v60, %v3581_v39  ;;  %v1123_v2 = vrot.slane %v2921_v61, %v3581_v39  ;;  %v1131_v3 = vrot.slane %v1124_v62, %v3581_v39  ;;  %v1139_v4 = vrot.slane %v2922_v63, %v3581_v39  ;;  %v3298_v60 = vld [vmem:[%s3945_s2 + $0xd0] ss:$8 sps:$4 sm:$0xff]   ;;  %v3299_v61 = vld [vmem:[%s3945_s2 + $0xe0] ss:$8 sps:$4 sm:$0xff]  }
 0x74a   : > { %v3300_v62 = vld [vmem:[%s3945_s2 + $0xf0] ss:$8 sps:$4 sm:$0xff]  }
 0x74b   : > { %v1141_v5 = vcombine.high %v1115_v1, %v1123_v2  ;;  %v1157_v6 = vcombine.high %v1131_v3, %v1139_v4  ;;  %v1140_v7 = vcombine.low %v1115_v1, %v1123_v2  ;;  %v1156_v8 = vcombine.low %v1131_v3, %v1139_v4  ;;  %v3302_v63 = vld [vmem:[%s3945_s2 + $0x110] ss:$8 sps:$4 sm:$0xff]   ;;  %v1297_v2 = vld [vmem:[%s3946_s3 + $0x7] ss:$0 sm:$0xff] }
 0x74c   : > { %v3304_v1 = vld [vmem:[%s3945_s2 + $0x130] ss:$8 sps:$4 sm:$0xff]  }
 0x74d   : > { %v1155_v9 = vrot.slane %v1141_v5, %v3584_v45  ;;  %v1171_v10 = vrot.slane %v1157_v6, %v3584_v45  ;;  %v1148_v11 = vrot.slane %v1140_v7, %v3584_v45  ;;  %v1164_v12 = vrot.slane %v1156_v8, %v3584_v45 }
 0x74f   : > { %v1174_v14 = vcombine.low %v1155_v9, %v1171_v10  ;;  %v1173_v16 = vcombine.high %v1148_v11, %v1164_v12  ;;  %v1172_v17 = vcombine.low %v1148_v11, %v1164_v12  ;;  %v1175_v18 = vcombine.high %v1155_v9, %v1171_v10 }
 0x751   : > { %1181 = vrot.lane.b32.xlu0 %v1174_v14, %s3400_s9  ;;  %1177 = vrot.lane.b32.xlu1 %v1173_v16, %s3401_s10 }
 0x755   : > { %1185 = vrot.lane.b32.xlu1 %v1175_v18, %s3402_s11 }
 0x7c3   : > { %v1178_v19 = vpop.permute.xlu1 %1177  ;;  %v1182_v20 = vpop.permute.xlu0 %1181 }
 0x7c4   : > { %v1188_v21 = vsel %vm438_vm2, %v1172_v17, %v1178_v19 }
 0x7c5   : > { %v1190_v23 = vsel %vm1189_vm4, %v1188_v21, %v1182_v20  ;;  %v1391_v20 = vld [vmem:[%s3946_s3 + $0x10] ss:$0 sm:$0xff] }
 0x7c7   : > { %v1186_v22 = vpop.permute.xlu1 %1185 }
 0x7c8   : > { %v1192_v25 = vsel %vm1191_vm5, %v1190_v23, %v1186_v22 }
 0x7c9   : > { %v1193_v26 = vpack.c.bf16 %v1192_v25, %v1192_v25 }
 0x7cb   : > { %3118 = vmatmul.mubr.msk.bf16.vlgmr.msra.gmra.mrb[16].mxu1 %vm211_vm0, %v1193_v26 }
 0x7cc   : > { %3149 = vmatprep.mubr.msk.bf16.mxu1 %vm3397_vm1, %v3396_v37  ;;  %3134 = vmatpush3.bf16.msra.mxu1 %v3297_v48 }
 0x7cd   : > { %3135 = vmatprep.subr.bf16.mxu1 %v3396_v37 }
 0x7d0   : > { %3136 = vmatpush3.bf16.msra.mxu1 %v3298_v60 }
 0x7d1   : > { %3137 = vmatprep.subr.bf16.mxu1 %v3396_v37 }
 0x7d4   : > { %3138 = vmatpush3.bf16.msra.mxu1 %v3299_v61 }
 0x7d5   : > { %3139 = vmatprep.subr.bf16.mxu1 %v3396_v37 }
 0x7d8   : > { %3140 = vmatpush3.bf16.msra.mxu1 %v3300_v62 }
 0x7d9   : > { %3141 = vmatprep.subr.bf16.mxu1 %v3396_v37 }
 0x89e   : > { %v1264_v30 = vpop.f32.mrb[16].mxu1 }
 0x89f   : > { %v1265_v31 = vadd.f32 %v1264_v30, %v1202_v29  ;;  %v3119_v32 = vpop.f32.mrb[17].mxu1 }
 0x8a0   : > { %v1267_v33 = vpop.f32.mrb[18].mxu1 }
 0x8a1   : > { %v3120_v34 = vpop.f32.mrb[19].mxu1  ;;  %v1270_v35 = vadd.f32 %v1265_v31, %v3477_v24  ;;  %v3294_v24 = vld [vmem:[%s3945_s2 + $0x90] ss:$8 sps:$4 sm:$0xff]  }
 0x8a2   : > { %3124 = vmatpush3.bf16.msra.mxu0 %v3294_v24  ;;  %v3316_v24 = vld [vmem:[%s3945_s2 + $0x174] ss:$8 sps:$4 sm:$0xff]  }
 0x8a3   : > { %v1273_v36 = vsel %vm211_vm0, %v1270_v35, 0.0  ;;  %3125 = vmatprep.subr.bf16.mxu0 %v3396_v37 }
 0x8a4   : > { %1274 = vadd.xlane.f32.xlu1 %v1273_v36  ;;  %v3307_v36 = vld [vmem:[%s3945_s2 + $0x144] ss:$8 sps:$4 sm:$0xff]  }
 0x8a6   : > { %3126 = vmatpush3.bf16.msra.mxu0 %v3295_v46 }
 0x8a7   : > { %3127 = vmatprep.subr.bf16.mxu0 %v3396_v37 }
 0x8aa   : > { %3128 = vmatpush3.bf16.msra.mxu0 %v3296_v47 }
 0x8ab   : > { %1563 = vmatprep.subr.bf16.mxu0 %v3307_v36 }
 0x931   : > { %v1275_v38 = vpop.xlane.xlu1 %1274 }
 0x932   : > { %v1276_v40 = vmul.f32 0.015625, %v1275_v38  ;;  %v3305_v38 = vld [vmem:[%s3945_s2 + $0x140] ss:$8 sps:$4 sm:$0xff]  }
 0x934   : > { %v1277_v41 = vsub.f32 %v1270_v35, %v1276_v40  ;;  %v3310_v40 = vld [vmem:[%s3945_s2 + $0x154] ss:$8 sps:$4 sm:$0xff]  }
 0x936   : > { %v1278_v42 = vmul.f32 %v1277_v41, %v1277_v41 }
 0x938   : > { %v1279_v43 = vsel %vm211_vm0, %v1278_v42, 0.0  ;;  %v3313_v42 = vld [vmem:[%s3945_s2 + $0x164] ss:$8 sps:$4 sm:$0xff]  }
 0x939   : > { %1280 = vadd.xlane.f32.xlu0 %v1279_v43  ;;  %v3311_v43 = vld [vmem:[%s3945_s2 + $0x160] ss:$8 sps:$4 sm:$0xff]  }
 0x9c6   : > { %v1281_v49 = vpop.xlane.xlu0 %1280 }
 0x9c7   : > { %v1282_v50 = vmul.f32 0.015625, %v1281_v49 }
 0x9c9   : > { %v1283_v51 = vadd.f32 1e-12, %v1282_v50  ;;  %v1481_v50 = vld [vmem:[%s3946_s3 + $0x11] ss:$0 sm:$0xff] }
 0x9cb   : > { %3355 = vrsqrt.f32 %v1283_v51 }
 0x9d5   : > { %v3356_v53 = vpop.eup %3355 }
 0x9d6   : > { %v1285_v55 = vmul.f32 %v3356_v53, %v1277_v41  ;;  %v3308_v41 = vld [vmem:[%s3945_s2 + $0x150] ss:$8 sps:$4 sm:$0xff]  }
 0x9d7   : > { %v1482_v53 = vld [vmem:[%s3946_s3 + $0x12] ss:$0 sm:$0xff] }
 0x9d8   : > { %v1286_v57 = vmul.f32 %v1285_v55, %v1271_v54 }
 0x9da   : > { %v1287_v58 = vadd.f32 %v1286_v57, %v1272_v56  ;;  %v3731_v57 = vld [vmem:[%s3946_s3 + $0x13] ss:$8 sm:$0x3] }
 0x9dc   : > { %v1288_v59 = vpack.c.bf16 %v1287_v58, %v1287_v58 }
 0x9de   : > { %3130 = vmatmul.mubr.msk.bf16.vlgmr.msra.gmra.mrb[20].mxu0 %vm211_vm0, %v1288_v59 }
 0x9df   : > { %1595 = vmatprep.mubr.bf16.mxu0 %v3391_v15  ;;  %v3301_v15 = vld [vmem:[%s3945_s2 + $0x100] ss:$8 sps:$4 sm:$0xff]   ;;  %1564 = vmatpush1.bf16.msra.mxu0 %v3305_v38 }
 0x9e0   : > { %3142 = vmatpush3.bf16.msra.mxu1 %v3301_v15  ;;  %1565 = vmatprep.subr.bf16.mxu0 %v3310_v40 }
 0x9e1   : > { %3143 = vmatprep.subr.bf16.mxu1 %v3396_v37 }
 0x9e3   : > { %1566 = vmatpush1.bf16.msra.mxu0 %v3308_v41  ;;  %v1517_v41 = vrot.slane %v3731_v57, %v249_v13 }
 0x9e4   : > { %3144 = vmatpush3.bf16.msra.mxu1 %v3302_v63  ;;  %1567 = vmatprep.subr.bf16.mxu0 %v3313_v42 }
 0x9e5   : > { %3145 = vmatprep.subr.bf16.mxu1 %v3396_v37 }
 0x9e7   : > { %1568 = vmatpush1.bf16.msra.mxu0 %v3311_v43 }
 0x9e8   : > { %3146 = vmatpush3.bf16.msra.mxu1 %v3303_v0  ;;  %1569 = vmatprep.subr.bf16.mxu0 %v3316_v24 }
 0x9e9   : > { %3147 = vmatprep.subr.bf16.mxu1 %v3396_v37 }
 0x9eb   : > { %1570 = vmatpush1.bf16.msra.mxu0 %v3314_v44 }
 0x9ec   : > { %3148 = vmatpush3.bf16.msra.mxu1 %v3304_v1  ;;  %3153 = vmatprep.subr.bf16.mxu0 %v3396_v37 }
 0x9ed   : > { %3165 = vmatprep.subr.bf16.mxu1 %v3396_v37 }
 0xab1   : > { %v1359_v3 = vpop.f32.mrb[20].mxu0 }
 0xab2   : > { %v1360_v4 = vadd.f32 %v1359_v3, %v1297_v2  ;;  %v3131_v5 = vpop.f32.mrb[21].mxu0 }
 0xab3   : > { %v1362_v6 = vpop.f32.mrb[22].mxu0 }
 0xab4   : > { %v1366_v7 = vmul.f32 0.044715, %v1360_v4  ;;  %v3132_v8 = vpop.f32.mrb[23].mxu0  ;;  %v1365_v16 = vmul.f32 0.5, %v1360_v4 }
 0xab6   : > { %v1367_v9 = vmul.f32 %v1366_v7, %v1360_v4 }
 0xab8   : > { %v1368_v10 = vmul.f32 %v1367_v9, %v1360_v4 }
 0xaba   : > { %v1369_v11 = vadd.f32 %v1368_v10, %v1360_v4 }
 0xabc   : > { %v1370_v12 = vmul.f32 0.7978846, %v1369_v11 }
 0xabe   : > { %3357 = vtanh.f32 %v1370_v12 }
 0xac8   : > { %v3358_v14 = vpop.eup %3357 }
 0xac9   : > { %v1372_v17 = vadd.f32 1.0, %v3358_v14 }
 0xacb   : > { %v1373_v18 = vmul.f32 %v1372_v17, %v1365_v16 }
 0xacd   : > { %v1374_v19 = vpack.c.bf16 %v1373_v18, %v1373_v18 }
 0xacf   : > { %3150 = vmatmul.mubr.bf16.vlgmr.msra.gmra.mrb[20].mxu1 %v1374_v19 }
 0xad0   : > { %3167 = vmatprep.mubr.msk.bf16.mxu1 %vm3397_vm1, %v3396_v37 }
 0xba2   : > { %v1474_v21 = vpop.f32.mrb[20].mxu1 }
 0xba3   : > { %v1475_v22 = vadd.f32 %v1474_v21, %v1391_v20  ;;  %v3151_v23 = vpop.f32.mrb[21].mxu1 }
 0xba4   : > { %v1477_v25 = vpop.f32.mrb[22].mxu1 }
 0xba5   : > { %v3152_v26 = vpop.f32.mrb[23].mxu1  ;;  %v1480_v29 = vadd.f32 %v1475_v22, %v1287_v58  ;;  %v1513_v58 = vrot.slane %v3731_v57, %v3485_v28 }
 0xba7   : > { %v1483_v30 = vsel %vm211_vm0, %v1480_v29, 0.0 }
 0xba8   : > { %1484 = vadd.xlane.f32.xlu1 %v1483_v30 }
 0xc35   : > { %v1485_v31 = vpop.xlane.xlu1 %1484 }
 0xc36   : > { %v1486_v32 = vmul.f32 0.015625, %v1485_v31 }
 0xc38   : > { %v1487_v33 = vsub.f32 %v1480_v29, %v1486_v32 }
 0xc3a   : > { %v1488_v34 = vmul.f32 %v1487_v33, %v1487_v33 }
 0xc3c   : > { %v1489_v35 = vsel %vm211_vm0, %v1488_v34, 0.0 }
 0xc3d   : > { %1490 = vadd.xlane.f32.xlu1 %v1489_v35 }
 0xcca   : > { %v1491_v46 = vpop.xlane.xlu1 %1490 }
 0xccb   : > { %v1492_v47 = vmul.f32 0.015625, %v1491_v46 }
 0xccd   : > { %v1493_v48 = vadd.f32 1e-12, %v1492_v47 }
 0xccf   : > { %3359 = vrsqrt.f32 %v1493_v48 }
 0xcd9   : > { %v3360_v49 = vpop.eup %3359 }
 0xcda   : > { %v1495_v51 = vmul.f32 %v3360_v49, %v1487_v33 }
 0xcdc   : > { %v1496_v54 = vmul.f32 %v1495_v51, %v1481_v50 }
 0xcde   : > { %v3721_v55 = vadd.f32 %v1496_v54, %v1482_v53 }
 0xce0   : > { %v1498_v56 = vpack.c.bf16 %v3721_v55, %v3721_v55 }
 0xce2   : > { %2950 = vmatmul.mubr.msk.bf16.vlgmr.msra.gmra.mrb[24].mxu0 %vm211_vm0, %v1498_v56 }
 0xce3   : > { %3155 = vmatprep.mubr.msk.bf16.mxu0 %vm3397_vm1, %v3396_v37 }
 0xdb5   : > { %v1597_v59 = vpop.f32.mrb[24].mxu0 }
 0xdb6   : > { %v1598_v60 = vadd.f32 %v1597_v59, %v1513_v58  ;;  %v3735_v61 = vpop.f32.mrb[25].mxu0 }
 0xdb7   : > { %v1601_v62 = vpop.f32.mrb[26].mxu0  ;;  %v1600_v42 = vadd.f32 %v3735_v61, %v1517_v41 }
 0xdb8   : > { %v1604_v15 = vpack.c.bf16 %v1598_v60, %v1598_v60  ;;  %v1602_v63 = vpop.f32.mrb[27].mxu0 }
 0xdb9   : > { %v1605_v43 = vpack.c.bf16 %v1600_v42, %v1600_v42 }
 0xdba   : > { %1609 = vrot.lane.b32.xlu0 %v1604_v15, %s3394_s22  ;;  %1607 = vrot.lane.b32.xlu1 %v1604_v15, %s3393_s21 }
 0xdbe   : > { %1611 = vrot.lane.b32.xlu1 %v1604_v15, %s3392_s20 }
 0xdc2   : > { %1623 = vrot.lane.b32.xlu1 %v1604_v15, %s3395_s23 }
 0xe2c   : > { %v1610_v0 = vpop.permute.xlu0 %1609  ;;  %v1608_v1 = vpop.permute.xlu1 %1607 }
 0xe2d   : > { %1627 = vrot.lane.b32.xlu1 %v1610_v0, %s3395_s23  ;;  %1625 = vrot.lane.b32.xlu0 %v1608_v1, %s3395_s23 }
 0xe30   : > { %v1612_v28 = vpop.permute.xlu1 %1611 }
 0xe31   : > { %1629 = vrot.lane.b32.xlu0 %v1612_v28, %s3395_s23 }
 0xe34   : > { %v1624_v2 = vpop.permute.xlu1 %1623 }
 0xe50   : > { %1635 = vxpose.xlu1.c.b16.start.end [1/1] (short) (narrow) %v1624_v2, 16 }
 0xe9f   : > { %v1626_v3 = vpop.permute.xlu0 %1625  ;;  %v1628_v4 = vpop.permute.xlu1 %1627 }
 0xea0   : > { %1651 = vxpose.xlu0.c.b16.start.end [1/1] (short) (narrow) %v1626_v3, 16 }
 0xea3   : > { %v1630_v5 = vpop.permute.xlu0 %1629 }
 0xea4   : > { %1683 = vxpose.xlu1.c.b16.start.end [1/1] (short) (narrow) %v1630_v5, 16  ;;  %1667 = vxpose.xlu0.c.b16.start.end [1/1] (short) (narrow) %v1628_v4, 16 }
 0xeb6   : > { %v1643_v6 = vpop.trf.xlu1 }
 0xeb7   : > { %3154 = vmatpush3.bf16.msra.mxu0 %v1643_v6 }
 0xeb8   : > { %3159 = vmatprep.subr.bf16.mxu0 %v3396_v37 }
 0xeba   : > { %3156 = vmatmul.mubr.msk.bf16.vlgmr.msra.gmra.mrb[28].mxu0 %vm438_vm2, %v1604_v15 }
 0xebb   : > { %3161 = vmatprep.mubr.msk.bf16.mxu0 %vm3397_vm1, %v3396_v37 }
 0xf06   : > { %v1659_v7 = vpop.trf.xlu0 }
 0xf07   : > { %3160 = vmatpush3.bf16.msra.mxu0 %v1659_v7 }
 0xf08   : > { %3171 = vmatprep.subr.bf16.mxu0 %v3396_v37 }
 0xf0a   : > { %v1675_v8 = vpop.trf.xlu0  ;;  %3162 = vmatmul.mubr.msk.bf16.vlgmr.msra.gmra.mrb[32].mxu0 %vm438_vm2, %v1608_v1  ;;  %v1691_v9 = vpop.trf.xlu1 }
 0xf0b   : > { %3166 = vmatpush3.bf16.msra.mxu1 %v1675_v8  ;;  %3172 = vmatpush3.bf16.msra.mxu0 %v1691_v9 }
 0xf0c   : > { %3173 = vmatprep.mubr.msk.bf16.mxu0 %vm3397_vm1, %v3396_v37  ;;  %3177 = vmatprep.subr.bf16.mxu1 %v3396_v37 }
 0xf0d   : > { %3183 = vmatprep.subr.bf16.mxu0 %v3396_v37 }
 0xf0e   : > { %3168 = vmatmul.mubr.msk.bf16.vlgmr.msra.gmra.mrb[24].mxu1 %vm438_vm2, %v1610_v0 }
 0xf0f   : > { %3179 = vmatprep.mubr.msk.bf16.mxu1 %vm3397_vm1, %v3396_v37 }
 0xf12   : > { %3174 = vmatmul.mubr.msk.bf16.vlgmr.msra.gmra.mrb[36].mxu0 %vm438_vm2, %v1612_v28 }
 0xf13   : > { %3185 = vmatprep.mubr.msk.bf16.mxu0 %vm3397_vm1, %v3396_v37 }
 0xf8d   : > { %v1736_v10 = vpop.f32.mrb[28].mxu0 }
 0xf8e   : > { %v1737_v11 = vadd.f32 %v1736_v10, %v3530_v52  ;;  %v3157_v12 = vpop.f32.mrb[29].mxu0 }
 0xf8f   : > { %v1739_v14 = vpop.f32.mrb[30].mxu0 }
 0xf90   : > { %v3158_v16 = vpop.f32.mrb[31].mxu0  ;;  %v1871_v17 = vsel %vm611_vm3, %v1737_v11, -inf }
 0xf91   : > { %1872 = vmax.xlane.f32.xlu0 %v1871_v17 }
 0xfdd   : > { %v1779_v18 = vpop.f32.mrb[32].mxu0 }
 0xfde   : > { %v1780_v19 = vadd.f32 %v1779_v18, %v3530_v52  ;;  %v3163_v20 = vpop.f32.mrb[33].mxu0 }
 0xfdf   : > { %v1782_v21 = vpop.f32.mrb[34].mxu0 }
 0xfe0   : > { %v3164_v22 = vpop.f32.mrb[35].mxu0  ;;  %v1874_v23 = vsel %vm611_vm3, %v1780_v19, -inf }
 0xfe1   : > { %1875 = vmax.xlane.f32.xlu1 %v1874_v23  ;;  %v1822_v25 = vpop.f32.mrb[24].mxu1 }
 0xfe2   : > { %v1823_v26 = vadd.f32 %v1822_v25, %v3530_v52  ;;  %v3169_v29 = vpop.f32.mrb[25].mxu1 }
 0xfe3   : > { %v1825_v30 = vpop.f32.mrb[26].mxu1 }
 0xfe4   : > { %v3170_v31 = vpop.f32.mrb[27].mxu1  ;;  %v1877_v32 = vsel %vm611_vm3, %v1823_v26, -inf }
 0xfe5   : > { %v1865_v33 = vpop.f32.mrb[36].mxu0  ;;  %1878 = vmax.xlane.f32.xlu0 %v1877_v32 }
 0xfe6   : > { %v1866_v34 = vadd.f32 %v1865_v33, %v3530_v52  ;;  %v3175_v35 = vpop.f32.mrb[37].mxu0 }
 0xfe7   : > { %v1868_v36 = vpop.f32.mrb[38].mxu0 }
 0xfe8   : > { %v3176_v38 = vpop.f32.mrb[39].mxu0  ;;  %v1880_v40 = vsel %vm611_vm3, %v1866_v34, -inf }
 0xfe9   : > { %1881 = vmax.xlane.f32.xlu1 %v1880_v40 }
 0xffb   : > { %1614 = vrot.lane.b32.xlu0 %v1605_v43, %s3393_s21 }
 0xfff   : > { %1620 = vrot.lane.b32.xlu0 %v1605_v43, %s3392_s20 }
0x101e   : > { %v1873_v44 = vpop.xlane.xlu0 %1872 }
0x101f   : > { %v1883_v24 = vsub.f32 %v1737_v11, %v1873_v44 }
0x1021   : > { %v1887_v52 = vmul.f32 1.442695, %v1883_v24 }
0x1023   : > { %3361 = vpow2.f32 %v1887_v52 }
0x102d   : > { %v3362_v46 = vpop.eup %3361 }
0x102e   : > { %v1895_v47 = vsel %vm611_vm3, %v3362_v46, 0.0 }
0x102f   : > { %1896 = vadd.xlane.f32.xlu1 %v1895_v47  ;;  %v3318_v47 = vld [vmem:[%s3945_s2 + $0x190] ss:$8 sps:$4 sm:$0xff]  }
0x106e   : > { %v1876_v48 = vpop.xlane.xlu1 %1875 }
0x106f   : > { %v1884_v49 = vsub.f32 %v1780_v19, %v1876_v48 }
0x1071   : > { %v1889_v27 = vmul.f32 1.442695, %v1884_v49 }
0x1072   : > { %v1879_v50 = vpop.xlane.xlu0 %1878 }
0x1073   : > { %3363 = vpow2.f32 %v1889_v27  ;;  %v1885_v13 = vsub.f32 %v1823_v26, %v1879_v50 }
0x1075   : > { %v1891_v51 = vmul.f32 1.442695, %v1885_v13 }
0x1076   : > { %v1882_v58 = vpop.xlane.xlu1 %1881  ;;  %v1615_v2 = vpop.permute.xlu0 %1614 }
0x1077   : > { %3365 = vpow2.f32 %v1891_v51  ;;  %v1886_v59 = vsub.f32 %v1866_v34, %v1882_v58 }
0x1079   : > { %v1893_v60 = vmul.f32 1.442695, %v1886_v59 }
0x107a   : > { %v1621_v3 = vpop.permute.xlu0 %1620 }
0x107b   : > { %3367 = vpow2.f32 %v1893_v60 }
0x107d   : > { %v3364_v53 = vpop.eup %3363 }
0x107e   : > { %v1898_v54 = vsel %vm611_vm3, %v3364_v53, 0.0 }
0x107f   : > { %1899 = vadd.xlane.f32.xlu1 %v1898_v54 }
0x1081   : > { %v3366_v56 = vpop.eup %3365 }
0x1082   : > { %v1901_v57 = vsel %vm611_vm3, %v3366_v56, 0.0 }
0x1083   : > { %1902 = vadd.xlane.f32.xlu0 %v1901_v57 }
0x1085   : > { %v3368_v61 = vpop.eup %3367 }
0x1086   : > { %v1904_v62 = vsel %vm611_vm3, %v3368_v61, 0.0 }
0x1090   : > { %1617 = vrot.lane.b32.xlu1 %v1605_v43, %s3394_s22 }
0x10b0   : > { %1919 = vxpose.xlu0.c.b16.start.end [1/1] (short) (narrow) %v1605_v43, 16 }
0x10b4   : > { %1905 = vadd.xlane.f32.xlu1 %v1904_v62 }
0x10bc   : > { %v1897_v15 = vpop.xlane.xlu1 %1896 }
0x10bd   : > { %3369 = vrcp.f32 %v1897_v15 }
0x10c7   : > { %v3370_v63 = vpop.eup %3369 }
0x10c8   : > { %v1911_v0 = vmul.f32 %v3370_v63, %v3362_v46  ;;  %v3317_v46 = vld [vmem:[%s3945_s2 + $0x180] ss:$8 sps:$4 sm:$0xff]  }
0x10c9   : > { %v3319_v63 = vld [vmem:[%s3945_s2 + $0x1a0] ss:$8 sps:$4 sm:$0xff]  }
0x10ca   : > { %v1915_v1 = vpack.c.bf16 %v1911_v0, %v1911_v0 }
0x10cc   : > { %v1987_v28 = vsel %vm611_vm3, %v1915_v1, 0 }
0x10cd   : > { %3178 = vmatpush3.bf16.xpose.msra.mxu1 %v1987_v28 }
0x10ce   : > { %3189 = vmatprep.subr.bf16.mxu1 %v3396_v37 }
0x10e1   : > { %1935 = vxpose.xlu1.c.b16.start.end [1/1] (short) (narrow) %v1615_v2, 16 }
0x110c   : > { %v1900_v4 = vpop.xlane.xlu1 %1899 }
0x110d   : > { %3371 = vrcp.f32 %v1900_v4 }
0x1110   : > { %v1618_v5 = vpop.permute.xlu1 %1617  ;;  %v1903_v6 = vpop.xlane.xlu0 %1902 }
0x1111   : > { %3373 = vrcp.f32 %v1903_v6  ;;  %1951 = vxpose.xlu0.c.b16.start.end [1/1] (short) (narrow) %v1618_v5, 16 }
0x1115   : > { %1967 = vxpose.xlu0.c.b16.start.end [1/1] (short) (narrow) %v1621_v3, 16 }
0x1116   : > { %v1927_v7 = vpop.trf.xlu0 }
0x1117   : > { %v3372_v8 = vpop.eup %3371  ;;  %3180 = vmatmul.mubr.msk.bf16.vlgmr.msra.gmra.mrb[28].mxu1 %vm611_vm3, %v1927_v7  ;;  %v3320_v7 = vld [vmem:[%s3945_s2 + $0x1b0] ss:$8 sps:$4 sm:$0xff]  }
0x1118   : > { %v1912_v9 = vmul.f32 %v3372_v8, %v3364_v53  ;;  %3191 = vmatprep.mubr.msk.bf16.mxu1 %vm3397_vm1, %v3396_v37 }
0x111a   : > { %v1916_v10 = vpack.c.bf16 %v1912_v9, %v1912_v9 }
0x111b   : > { %v3374_v11 = vpop.eup %3373 }
0x111c   : > { %v2034_v12 = vsel %vm611_vm3, %v1916_v10, 0  ;;  %v1913_v14 = vmul.f32 %v3374_v11, %v3366_v56 }
0x111d   : > { %3184 = vmatpush3.bf16.xpose.msra.mxu0 %v2034_v12 }
0x111e   : > { %v1917_v16 = vpack.c.bf16 %v1913_v14, %v1913_v14  ;;  %3195 = vmatprep.subr.bf16.mxu0 %v3396_v37 }
0x1120   : > { %v2081_v17 = vsel %vm611_vm3, %v1917_v16, 0 }
0x1121   : > { %3190 = vmatpush3.bf16.xpose.msra.mxu1 %v2081_v17 }
0x1122   : > { %3201 = vmatprep.subr.bf16.mxu1 %v3396_v37 }
0x1141   : > { %v1906_v18 = vpop.xlane.xlu1 %1905 }
0x1142   : > { %3375 = vrcp.f32 %v1906_v18 }
0x1147   : > { %v1943_v19 = vpop.trf.xlu1 }
0x1148   : > { %3186 = vmatmul.mubr.msk.bf16.vlgmr.msra.gmra.mrb[40].mxu0 %vm611_vm3, %v1943_v19 }
0x1149   : > { %3197 = vmatprep.mubr.msk.bf16.mxu0 %vm3397_vm1, %v3396_v37 }
0x114c   : > { %v3376_v20 = vpop.eup %3375 }
0x114d   : > { %v1914_v21 = vmul.f32 %v3376_v20, %v3368_v61 }
0x114f   : > { %v1918_v22 = vpack.c.bf16 %v1914_v21, %v1914_v21 }
0x1151   : > { %v2128_v23 = vsel %vm611_vm3, %v1918_v22, 0 }
0x1152   : > { %3196 = vmatpush3.bf16.xpose.msra.mxu0 %v2128_v23 }
0x1153   : > { %3213 = vmatprep.subr.bf16.mxu0 %v3396_v37 }
0x1177   : > { %v1959_v25 = vpop.trf.xlu0 }
0x1178   : > { %3192 = vmatmul.mubr.msk.bf16.vlgmr.msra.gmra.mrb[32].mxu1 %vm611_vm3, %v1959_v25 }
0x1179   : > { %3209 = vmatprep.mubr.msk.bf16.mxu1 %vm3397_vm1, %v3396_v37  ;;  %3202 = vmatpush3.bf16.msra.mxu1 %v3317_v46 }
0x117a   : > { %3203 = vmatprep.subr.bf16.mxu1 %v3396_v37 }
0x117b   : > { %v1975_v26 = vpop.trf.xlu0 }
0x117c   : > { %3198 = vmatmul.mubr.msk.bf16.vlgmr.msra.gmra.mrb[44].mxu0 %vm611_vm3, %v1975_v26 }
0x117d   : > { %3221 = vmatprep.mubr.msk.bf16.mxu0 %vm3397_vm1, %v3396_v37  ;;  %3204 = vmatpush3.bf16.msra.mxu1 %v3318_v47 }
0x117e   : > { %3205 = vmatprep.subr.bf16.mxu1 %v3396_v37 }
0x1181   : > { %3206 = vmatpush3.bf16.msra.mxu1 %v3319_v63  ;;  %v3328_v63 = vld [vmem:[%s3945_s2 + $0x230] ss:$8 sps:$4 sm:$0xff]  }
0x1182   : > { %3207 = vmatprep.subr.bf16.mxu1 %v3396_v37 }
0x1185   : > { %3208 = vmatpush3.bf16.msra.mxu1 %v3320_v7 }
0x1186   : > { %3225 = vmatprep.subr.bf16.mxu1 %v3396_v37 }
0x11ea   : > { %v2023_v29 = vpop.f32.mrb[28].mxu1 }
0x11eb   : > { %2171 = vxpose.xlu1.b32.start [1/2] (short) (narrow) %v2023_v29, 8  ;;  %v3181_v30 = vpop.f32.mrb[29].mxu1 }
0x11ec   : > { %v2026_v31 = vpop.f32.mrb[30].mxu1 }
0x11ed   : > { %v3182_v32 = vpop.f32.mrb[31].mxu1 }
0x11ef   : > { %2172 = vxpose.xlu1.b32.end [2/2] (short) (narrow) %v2026_v31, 8 }
0x121b   : > { %v2070_v33 = vpop.f32.mrb[40].mxu0 }
0x121c   : > { %2203 = vxpose.xlu0.b32.start [1/2] (short) (narrow) %v2070_v33, 8  ;;  %v3187_v34 = vpop.f32.mrb[41].mxu0 }
0x121d   : > { %v2073_v35 = vpop.f32.mrb[42].mxu0  ;;  %v2459_v34 = vld [vmem:[%s3946_s3 + $0x14] ss:$0 sm:$0xff] }
0x121e   : > { %v3188_v36 = vpop.f32.mrb[43].mxu0 }
0x1220   : > { %2204 = vxpose.xlu0.b32.end [2/2] (short) (narrow) %v2073_v35, 8 }
0x124b   : > { %v2117_v38 = vpop.f32.mrb[32].mxu1 }
0x124c   : > { %2235 = vxpose.xlu0.b32.start [1/2] (short) (narrow) %v2117_v38, 8  ;;  %v3193_v40 = vpop.f32.mrb[33].mxu1 }
0x124d   : > { %v2120_v41 = vpop.f32.mrb[34].mxu1 }
0x124e   : > { %v3194_v42 = vpop.f32.mrb[35].mxu1 }
0x124f   : > { %v2164_v43 = vpop.f32.mrb[44].mxu0 }
0x1250   : > { %2267 = vxpose.xlu1.b32.start [1/2] (short) (narrow) %v2164_v43, 8  ;;  %2236 = vxpose.xlu0.b32.end [2/2] (short) (narrow) %v2120_v41, 8  ;;  %v3199_v44 = vpop.f32.mrb[45].mxu0 }
0x1251   : > { %v2167_v24 = vpop.f32.mrb[46].mxu0 }
0x1252   : > { %v3200_v52 = vpop.f32.mrb[47].mxu0 }
0x1254   : > { %2268 = vxpose.xlu1.b32.end [2/2] (short) (narrow) %v2167_v24, 8 }
0x126b   : > { %v2187_v49 = vpop.trf.xlu1 }
0x129c   : > { %v2219_v48 = vpop.trf.xlu0 }
0x12cc   : > { %v2251_v27 = vpop.trf.xlu0 }
0x12cd   : > { %v2299_v50 = vcombine.low %v2187_v49, %v2251_v27  ;;  %v2300_v13 = vcombine.high %v2187_v49, %v2251_v27  ;;  %v3323_v49 = vld [vmem:[%s3945_s2 + $0x1e0] ss:$8 sps:$4 sm:$0xff]   ;;  %v3324_v27 = vld [vmem:[%s3945_s2 + $0x1f0] ss:$8 sps:$4 sm:$0xff]  }
0x12cf   : > { %v2307_v58 = vrot.slane %v2299_v50, %v3581_v39  ;;  %v2314_v59 = vrot.slane %v2300_v13, %v3581_v39  ;;  %v3325_v50 = vld [vmem:[%s3945_s2 + $0x200] ss:$8 sps:$4 sm:$0xff]  }
0x12d0   : > { %v2283_v51 = vpop.trf.xlu1 }
0x12d1   : > { %v2315_v53 = vcombine.low %v2219_v48, %v2283_v51  ;;  %v2316_v54 = vcombine.high %v2219_v48, %v2283_v51  ;;  %v3321_v48 = vld [vmem:[%s3945_s2 + $0x1c0] ss:$8 sps:$4 sm:$0xff]  }
0x12d2   : > { %3214 = vmatpush3.bf16.msra.mxu0 %v3321_v48 }
0x12d3   : > { %v2323_v56 = vrot.slane %v2315_v53, %v3581_v39  ;;  %v2330_v57 = vrot.slane %v2316_v54, %v3581_v39  ;;  %3215 = vmatprep.subr.bf16.mxu0 %v3396_v37 }
0x12d5   : > { %v2331_v60 = vcombine.low %v2307_v58, %v2323_v56  ;;  %v2332_v61 = vcombine.high %v2307_v58, %v2323_v56  ;;  %v2347_v62 = vcombine.low %v2314_v59, %v2330_v57  ;;  %v2348_v15 = vcombine.high %v2314_v59, %v2330_v57  ;;  %v2528_v56 = vld [vmem:[%s3946_s3 + $0x15] ss:$0 sm:$0xff]  ;;  %v2529_v58 = vld [vmem:[%s3946_s3 + $0x16] ss:$0 sm:$0xff] }
0x12d7   : > { %v2339_v0 = vrot.slane %v2331_v60, %v3584_v45  ;;  %v2346_v1 = vrot.slane %v2332_v61, %v3584_v45  ;;  %v2355_v28 = vrot.slane %v2347_v62, %v3584_v45  ;;  %v2362_v2 = vrot.slane %v2348_v15, %v3584_v45  ;;  %v3326_v62 = vld [vmem:[%s3945_s2 + $0x210] ss:$8 sps:$4 sm:$0xff]   ;;  %v3327_v15 = vld [vmem:[%s3945_s2 + $0x220] ss:$8 sps:$4 sm:$0xff]  }
0x12d9   : > { %v2367_v3 = vcombine.low %v2339_v0, %v2346_v1  ;;  %v2959_v4 = vcombine.high %v2339_v0, %v2346_v1  ;;  %v2383_v5 = vcombine.low %v2355_v28, %v2362_v2  ;;  %v2960_v6 = vcombine.high %v2355_v28, %v2362_v2  ;;  %v3329_v0 = vld [vmem:[%s3945_s2 + $0x240] ss:$8 sps:$4 sm:$0xff]   ;;  %v3330_v1 = vld [vmem:[%s3945_s2 + $0x250] ss:$8 sps:$4 sm:$0xff]  }
0x12da   : > { %v3331_v28 = vld [vmem:[%s3945_s2 + $0x260] ss:$8 sps:$4 sm:$0xff]   ;;  %v3332_v2 = vld [vmem:[%s3945_s2 + $0x270] ss:$8 sps:$4 sm:$0xff]  }
0x12db   : > { %v2374_v8 = vrot.slane %v2367_v3, %v3581_v39  ;;  %v2382_v9 = vrot.slane %v2959_v4, %v3581_v39  ;;  %v2390_v10 = vrot.slane %v2383_v5, %v3581_v39  ;;  %v2398_v11 = vrot.slane %v2960_v6, %v3581_v39  ;;  %v2554_v3 = vld [vmem:[%s3946_s3 + $0x17] ss:$0 sm:$0xff] }
0x12dd   : > { %v2400_v12 = vcombine.high %v2374_v8, %v2382_v9  ;;  %v2416_v14 = vcombine.high %v2390_v10, %v2398_v11  ;;  %v2399_v16 = vcombine.low %v2374_v8, %v2382_v9  ;;  %v2415_v17 = vcombine.low %v2390_v10, %v2398_v11 }
0x12df   : > { %v2414_v18 = vrot.slane %v2400_v12, %v3584_v45  ;;  %v2430_v19 = vrot.slane %v2416_v14, %v3584_v45  ;;  %v2407_v20 = vrot.slane %v2399_v16, %v3584_v45  ;;  %v2423_v21 = vrot.slane %v2415_v17, %v3584_v45 }
0x12e1   : > { %v2433_v22 = vcombine.low %v2414_v18, %v2430_v19  ;;  %v2432_v23 = vcombine.high %v2407_v20, %v2423_v21  ;;  %v2431_v25 = vcombine.low %v2407_v20, %v2423_v21  ;;  %v2434_v39 = vcombine.high %v2414_v18, %v2430_v19  ;;  %v2648_v21 = vld [vmem:[%s3946_s3 + $0x20] ss:$0 sm:$0xff] }
0x12e3   : > { %2440 = vrot.lane.b32.xlu1 %v2433_v22, %s3400_s9  ;;  %2436 = vrot.lane.b32.xlu0 %v2432_v23, %s3401_s10 }
0x12e7   : > { %2444 = vrot.lane.b32.xlu1 %v2434_v39, %s3402_s11 }
0x1355   : > { %v2441_v26 = vpop.permute.xlu1 %2440  ;;  %v2437_v29 = vpop.permute.xlu0 %2436 }
0x1356   : > { %v2447_v30 = vsel %vm438_vm2, %v2431_v25, %v2437_v29 }
0x1357   : > { %v2448_v32 = vsel %vm1189_vm4, %v2447_v30, %v2441_v26 }
0x1359   : > { %v2445_v31 = vpop.permute.xlu1 %2444 }
0x135a   : > { %v2449_v33 = vsel %vm1191_vm5, %v2448_v32, %v2445_v31 }
0x135b   : > { %v2450_v45 = vpack.c.bf16 %v2449_v33, %v2449_v33 }
0x135d   : > { %3210 = vmatmul.mubr.msk.bf16.vlgmr.msra.gmra.mrb[36].mxu1 %vm211_vm0, %v2450_v45 }
0x135e   : > { %3241 = vmatprep.mubr.msk.bf16.mxu1 %vm3397_vm1, %v3396_v37  ;;  %3226 = vmatpush3.bf16.msra.mxu1 %v3325_v50 }
0x135f   : > { %3227 = vmatprep.subr.bf16.mxu1 %v3396_v37 }
0x1362   : > { %3228 = vmatpush3.bf16.msra.mxu1 %v3326_v62 }
0x1363   : > { %3229 = vmatprep.subr.bf16.mxu1 %v3396_v37 }
0x1366   : > { %3230 = vmatpush3.bf16.msra.mxu1 %v3327_v15 }
0x1367   : > { %3231 = vmatprep.subr.bf16.mxu1 %v3396_v37 }
0x136a   : > { %3232 = vmatpush3.bf16.msra.mxu1 %v3328_v63 }
0x136b   : > { %3233 = vmatprep.subr.bf16.mxu1 %v3396_v37 }
0x136e   : > { %3234 = vmatpush3.bf16.msra.mxu1 %v3329_v0 }
0x136f   : > { %3235 = vmatprep.subr.bf16.mxu1 %v3396_v37 }
0x1372   : > { %3236 = vmatpush3.bf16.msra.mxu1 %v3330_v1 }
0x1373   : > { %3237 = vmatprep.subr.bf16.mxu1 %v3396_v37 }
0x1376   : > { %3238 = vmatpush3.bf16.msra.mxu1 %v3331_v28 }
0x1377   : > { %3239 = vmatprep.subr.bf16.mxu1 %v3396_v37 }
0x137a   : > { %3240 = vmatpush3.bf16.msra.mxu1 %v3332_v2 }
0x1430   : > { %v2521_v35 = vpop.f32.mrb[36].mxu1 }
0x1431   : > { %v2522_v36 = vadd.f32 %v2521_v35, %v2459_v34  ;;  %v3211_v38 = vpop.f32.mrb[37].mxu1  ;;  %v3333_v35 = vld [vmem:[%s3945_s2 + $0x280] ss:$8 sps:$4 sm:$0xff]  }
0x1432   : > { %v2524_v40 = vpop.f32.mrb[38].mxu1  ;;  %v3335_v38 = vld [vmem:[%s3945_s2 + $0x2a0] ss:$8 sps:$4 sm:$0xff]  }
0x1433   : > { %v3212_v41 = vpop.f32.mrb[39].mxu1  ;;  %v2527_v42 = vadd.f32 %v2522_v36, %v3721_v55  ;;  %v3322_v55 = vld [vmem:[%s3945_s2 + $0x1d0] ss:$8 sps:$4 sm:$0xff]  }
0x1434   : > { %3216 = vmatpush3.bf16.msra.mxu0 %v3322_v55  ;;  %v3334_v36 = vld [vmem:[%s3945_s2 + $0x290] ss:$8 sps:$4 sm:$0xff]  }
0x1435   : > { %v2530_v43 = vsel %vm211_vm0, %v2527_v42, 0.0  ;;  %3217 = vmatprep.subr.bf16.mxu0 %v3396_v37  ;;  %v3336_v40 = vld [vmem:[%s3945_s2 + $0x2b0] ss:$8 sps:$4 sm:$0xff]  }
0x1436   : > { %2531 = vadd.xlane.f32.xlu1 %v2530_v43 }
0x1438   : > { %3218 = vmatpush3.bf16.msra.mxu0 %v3323_v49 }
0x1439   : > { %3219 = vmatprep.subr.bf16.mxu0 %v3396_v37 }
0x143c   : > { %3220 = vmatpush3.bf16.msra.mxu0 %v3324_v27 }
0x143d   : > { %3245 = vmatprep.subr.bf16.mxu0 %v3396_v37 }
0x14c3   : > { %v2532_v44 = vpop.xlane.xlu1 %2531 }
0x14c4   : > { %v2533_v24 = vmul.f32 0.015625, %v2532_v44 }
0x14c6   : > { %v2534_v52 = vsub.f32 %v2527_v42, %v2533_v24  ;;  %v2738_v24 = vld [vmem:[%s3946_s3 + $0x21] ss:$0 sm:$0xff] }
0x14c8   : > { %v2535_v46 = vmul.f32 %v2534_v52, %v2534_v52 }
0x14ca   : > { %v2536_v47 = vsel %vm211_vm0, %v2535_v46, 0.0  ;;  %v2739_v46 = vld [vmem:[%s3946_s3 + $0x22] ss:$0 sm:$0xff] }
0x14cb   : > { %2537 = vadd.xlane.f32.xlu0 %v2536_v47 }
0x1558   : > { %v2538_v13 = vpop.xlane.xlu0 %2537 }
0x1559   : > { %v2539_v51 = vmul.f32 0.015625, %v2538_v13 }
0x155b   : > { %v2540_v53 = vadd.f32 1e-12, %v2539_v51 }
0x155d   : > { %3377 = vrsqrt.f32 %v2540_v53 }
0x1567   : > { %v3378_v54 = vpop.eup %3377 }
0x1568   : > { %v2542_v57 = vmul.f32 %v3378_v54, %v2534_v52 }
0x156a   : > { %v2543_v59 = vmul.f32 %v2542_v57, %v2528_v56 }
0x156c   : > { %v2544_v60 = vadd.f32 %v2543_v59, %v2529_v58 }
0x156e   : > { %v2545_v61 = vpack.c.bf16 %v2544_v60, %v2544_v60 }
0x1570   : > { %3222 = vmatmul.mubr.msk.bf16.vlgmr.msra.gmra.mrb[48].mxu0 %vm211_vm0, %v2545_v61 }
0x1571   : > { %3253 = vmatprep.mubr.msk.bf16.mxu0 %vm3397_vm1, %v3396_v37  ;;  %3246 = vmatpush3.bf16.msra.mxu0 %v3333_v35 }
0x1572   : > { %3247 = vmatprep.subr.bf16.mxu0 %v3396_v37 }
0x1575   : > { %3248 = vmatpush3.bf16.msra.mxu0 %v3334_v36 }
0x1576   : > { %3249 = vmatprep.subr.bf16.mxu0 %v3396_v37 }
0x1579   : > { %3250 = vmatpush3.bf16.msra.mxu0 %v3335_v38 }
0x157a   : > { %3251 = vmatprep.subr.bf16.mxu0 %v3396_v37  ;;  %v2764_v37 = vld [vmem:[%s3946_s3 + $0x2] ss:$0 sm:$0xff] }
0x157d   : > { %3252 = vmatpush3.bf16.msra.mxu0 %v3336_v40 }
0x1643   : > { %v2616_v4 = vpop.f32.mrb[48].mxu0 }
0x1644   : > { %v2617_v5 = vadd.f32 %v2616_v4, %v2554_v3  ;;  %v3223_v6 = vpop.f32.mrb[49].mxu0 }
0x1645   : > { %v2619_v7 = vpop.f32.mrb[50].mxu0 }
0x1646   : > { %v2623_v8 = vmul.f32 0.044715, %v2617_v5  ;;  %v3224_v9 = vpop.f32.mrb[51].mxu0  ;;  %v2622_v17 = vmul.f32 0.5, %v2617_v5 }
0x1648   : > { %v2624_v10 = vmul.f32 %v2623_v8, %v2617_v5 }
0x164a   : > { %v2625_v11 = vmul.f32 %v2624_v10, %v2617_v5 }
0x164c   : > { %v2626_v12 = vadd.f32 %v2625_v11, %v2617_v5 }
0x164e   : > { %v2627_v14 = vmul.f32 0.7978846, %v2626_v12 }
0x1650   : > { %3379 = vtanh.f32 %v2627_v14 }
0x165a   : > { %v3380_v16 = vpop.eup %3379 }
0x165b   : > { %v2629_v18 = vadd.f32 1.0, %v3380_v16 }
0x165d   : > { %v2630_v19 = vmul.f32 %v2629_v18, %v2622_v17 }
0x165f   : > { %v2631_v20 = vpack.c.bf16 %v2630_v19, %v2630_v19 }
0x1661   : > { %3242 = vmatmul.mubr.bf16.vlgmr.msra.gmra.mrb[40].mxu1 %v2631_v20 }
0x1734   : > { %v2731_v22 = vpop.f32.mrb[40].mxu1 }
0x1735   : > { %v2732_v23 = vadd.f32 %v2731_v22, %v2648_v21  ;;  %v3243_v25 = vpop.f32.mrb[41].mxu1 }
0x1736   : > { %v2734_v39 = vpop.f32.mrb[42].mxu1 }
0x1737   : > { %v3244_v26 = vpop.f32.mrb[43].mxu1  ;;  %v2737_v29 = vadd.f32 %v2732_v23, %v2544_v60 }
0x1739   : > { %v2740_v30 = vsel %vm211_vm0, %v2737_v29, 0.0 }
0x173a   : > { %2741 = vadd.xlane.f32.xlu0 %v2740_v30 }
0x17c7   : > { %v2742_v31 = vpop.xlane.xlu0 %2741 }
0x17c8   : > { %v2743_v32 = vmul.f32 0.015625, %v2742_v31 }
0x17ca   : > { %v2744_v33 = vsub.f32 %v2737_v29, %v2743_v32 }
0x17cc   : > { %v2745_v45 = vmul.f32 %v2744_v33, %v2744_v33 }
0x17ce   : > { %v2746_v34 = vsel %vm211_vm0, %v2745_v45, 0.0 }
0x17cf   : > { %2747 = vadd.xlane.f32.xlu1 %v2746_v34 }
0x185c   : > { %v2748_v41 = vpop.xlane.xlu1 %2747 }
0x185d   : > { %v2749_v42 = vmul.f32 0.015625, %v2748_v41 }
0x185f   : > { %v2750_v43 = vadd.f32 1e-12, %v2749_v42 }
0x1861   : > { %3381 = vrsqrt.f32 %v2750_v43 }
0x186b   : > { %v3382_v44 = vpop.eup %3381 }
0x186c   : > { %v2752_v52 = vmul.f32 %v3382_v44, %v2744_v33 }
0x186e   : > { %v2753_v47 = vmul.f32 %v2752_v52, %v2738_v24 }
0x1870   : > { %v2754_v48 = vadd.f32 %v2753_v47, %v2739_v46 }
0x1872   : > { %v2755_v55 = vpack.c.bf16 %v2754_v48, %v2754_v48 }
0x1874   : > { %3254 = vmatmul.mubr.msk.bf16.vlgmr.msra.gmra.mrb[52].mxu0 %vm211_vm0, %v2755_v55 }
0x1947   : > { %v2826_v49 = vpop.f32.mrb[52].mxu0 }
0x1948   : > { %v2827_v27 = vadd.f32 %v2826_v49, %v2764_v37  ;;  %v3255_v50 = vpop.f32.mrb[53].mxu0 }
0x1949   : > { %v2829_v13 = vpop.f32.mrb[54].mxu0 }
0x194a   : > { %2832 = vst [vmem:[%s206_s6] sm:$0xff] %v2827_v27  ;;  %v3256_v51 = vpop.f32.mrb[55].mxu0 }
0x194b PF: > { %s14_s15 = sadd.s32 1, %s3389_s15  }
0x194c   : > { %p11_p4 = scmp.ge.s32.totalorder %s14_s15, 4  }
0x194e   :  { %13 = sbr.rel (!%p11_p4) target bundleno = 1 (0x1), region = 71 }

</bundles_post_ra>
